<compile_context>
chip_gen: v7x
topology: tpu7x:2x2x1
jax: 0.10.0
libtpu: 0.0.40
codegen_flags: <defaults>
</compile_context>

<pallas_src>
import functools

import jax
import jax.numpy as jnp
import numpy as np
from jax.experimental import pallas as pl
from jax.experimental.pallas import tpu as pltpu


# --------------------------------------------------------------------------
# Pallas kernel: one (tm x K) @ (K x tn) bf16 matmul per grid step (full K in
# the block, f32 accumulation) with fused per-channel affine (folded BatchNorm)
# and activation (relu / tanh / none).
# --------------------------------------------------------------------------
def _fused_matmul_kernel(x_ref, w_ref, scale_ref, bias_ref, o_ref, *, activation):
    acc = jnp.dot(x_ref[0], w_ref[0], preferred_element_type=jnp.float32)
    y = acc * scale_ref[...] + bias_ref[...]
    if activation == "relu":
        y = jnp.maximum(y, 0.0)
    elif activation == "tanh":
        y = jnp.tanh(y)
    o_ref[0] = y.astype(o_ref.dtype)


def _round_up(x, m):
    return (x + m - 1) // m * m


def fused_matmul_phases(x, w, scale, bias, activation, out_dtype,
                        tm_max=512, tn_max=256):
    """act((x[p] @ w[p]) * scale + bias) for every phase p, in one pallas_call.

    x: [P, M, K]  (any float dtype; cast to bf16)
    w: [P, K, N]
    scale, bias: [N] (f32 affine, applied to the f32 accumulator)
    returns [P, M, N] in out_dtype.
    """
    P, M, K = x.shape
    P2, K2, Nc = w.shape
    assert P == P2 and K == K2

    Kp = _round_up(K, 128)                       # full K lives in one block
    tn = tn_max if Nc >= tn_max else 128
    Np = _round_up(Nc, tn)
    tm = tm_max if M >= tm_max else _round_up(M, 16)
    Mp = _round_up(M, tm)

    xp = jnp.pad(x, ((0, 0), (0, Mp - M), (0, Kp - K))).astype(jnp.bfloat16)
    wp = jnp.pad(w, ((0, 0), (0, Kp - K), (0, Np - Nc))).astype(jnp.bfloat16)
    sp = jnp.pad(scale.astype(jnp.float32), (0, Np - Nc)).reshape(1, Np)
    bp = jnp.pad(bias.astype(jnp.float32), (0, Np - Nc)).reshape(1, Np)

    grid = (P, Mp // tm, Np // tn)
    out = pl.pallas_call(
        functools.partial(_fused_matmul_kernel, activation=activation),
        out_shape=jax.ShapeDtypeStruct((P, Mp, Np), out_dtype),
        grid_spec=pltpu.PrefetchScalarGridSpec(
            num_scalar_prefetch=0,
            grid=grid,
            in_specs=[
                pl.BlockSpec((1, tm, Kp), lambda p, i, j: (p, i, 0)),
                pl.BlockSpec((1, Kp, tn), lambda p, i, j: (p, 0, j)),
                pl.BlockSpec((1, tn), lambda p, i, j: (0, j)),
                pl.BlockSpec((1, tn), lambda p, i, j: (0, j)),
            ],
            out_specs=pl.BlockSpec((1, tm, tn), lambda p, i, j: (p, i, j)),
        ),
        compiler_params=pltpu.CompilerParams(
            dimension_semantics=("parallel", "parallel", "parallel")),
    )(xp, wp, sp, bp)
    return out[:, :M, :Nc]


# --------------------------------------------------------------------------
# Glue (plain JAX): sub-pixel decomposition of ConvTranspose2d(K=4, s=2, p=1).
# PyTorch ConvTranspose2d weight layout: (C_in, C_out, kH, kW).
#
# out[n, 2i+py, 2j+px, o] = sum_{u,v in {0,1}, c}
#     xp[n, i+py+u, j+px+v, c] * w[c, o, (3-py)-2u, (3-px)-2v]
# where xp is the input padded by 1 on each spatial side.
# --------------------------------------------------------------------------
def subpixel_patches_and_weights(x_nhwc, w_deconv):
    N, H, W, Cin = x_nhwc.shape
    Cin_w, Cout, K, Kw = w_deconv.shape
    assert Cin == Cin_w and K == 4 and Kw == 4

    xp = jnp.pad(x_nhwc, ((0, 0), (1, 1), (1, 1), (0, 0)))

    phase_patches, phase_w = [], []
    for py in range(2):
        for px in range(2):
            cells = [xp[:, py + u:py + u + H, px + v:px + v + W, :]
                     for u in range(2) for v in range(2)]
            p = jnp.stack(cells, axis=3)                       # [N,H,W,4,Cin]
            phase_patches.append(p.reshape(N * H * W, 4 * Cin))

            wcells = [w_deconv[:, :, 3 - py - 2 * u, 3 - px - 2 * v]   # [Cin,Cout]
                      for u in range(2) for v in range(2)]
            phase_w.append(jnp.stack(wcells, axis=0).reshape(4 * Cin, Cout))

    patches = jnp.stack(phase_patches, axis=0)                 # [4, N*H*W, 4*Cin]
    w_mat = jnp.stack(phase_w, axis=0)                         # [4, 4*Cin, Cout]
    return patches, w_mat, (N, H, W, Cout)


def interleave_phases(y_phases, N, H, W, Cout):
    """[4, N*H*W, Cout] (phase p = py*2+px) -> [N, 2H, 2W, Cout]."""
    y = y_phases.reshape(2, 2, N, H, W, Cout)
    y = jnp.transpose(y, (2, 3, 0, 4, 1, 5))                   # [N,H,py,W,px,C]
    return y.reshape(N, 2 * H, 2 * W, Cout)


def layer1_matmul_inputs(x_nhwc, w_deconv):
    """ConvTranspose2d(K=4, s=1, p=0) on a 1x1 input == dense matmul."""
    N, H, W, Cin = x_nhwc.shape
    assert H == 1 and W == 1
    Cin_w, Cout, K, Kw = w_deconv.shape
    assert Cin == Cin_w and K == Kw
    x2d = x_nhwc.reshape(N, Cin)[None]                                   # [1,N,Cin]
    w_mat = jnp.transpose(w_deconv, (0, 2, 3, 1)).reshape(Cin, K * K * Cout)[None]
    return x2d, w_mat, (N, K, K, Cout)


# --------------------------------------------------------------------------
# Generator forward (Pallas path).
# --------------------------------------------------------------------------
_BN_EPS = 1e-5


def _bn_fold(bn_params):
    gamma, beta, mean, var = bn_params
    scale = gamma / jnp.sqrt(var + _BN_EPS)
    bias = beta - mean * scale
    return scale, bias


def generator_forward(x_nchw, weights):
    x = jnp.transpose(x_nchw, (0, 2, 3, 1))            # NCHW -> NHWC

    # --- layer 1: ConvTranspose2d(nz, ngf*8, 4, s=1, p=0) on 1x1 input + BN + ReLU ---
    w = weights["dconv1"]
    x2d, w_mat, (N, Ho, Wo, Co) = layer1_matmul_inputs(x, w)
    scale, bias = _bn_fold(weights["bn1"])
    scale = jnp.tile(scale, Ho * Wo)                    # column order is (ky,kx,o)
    bias = jnp.tile(bias, Ho * Wo)
    y = fused_matmul_phases(x2d, w_mat, scale, bias, "relu", jnp.bfloat16)
    x = y[0].reshape(N, Ho, Wo, Co)                     # bf16 NHWC

    # --- layers 2-5: ConvTranspose2d(K=4, s=2, p=1) via sub-pixel phases ---
    layer_cfgs = [("dconv2", "bn2", "relu"),
                  ("dconv3", "bn3", "relu"),
                  ("dconv4", "bn4", "relu"),
                  ("dconv5", None, "tanh")]
    for wname, bnname, act in layer_cfgs:
        w = weights[wname]
        patches, w_mat, (N, H, W, Co) = subpixel_patches_and_weights(x, w)
        if bnname is not None:
            scale, bias = _bn_fold(weights[bnname])
        else:
            scale = jnp.ones((Co,), jnp.float32)
            bias = jnp.zeros((Co,), jnp.float32)
        out_dtype = jnp.float32 if act == "tanh" else jnp.bfloat16
        y = fused_matmul_phases(patches, w_mat, scale, bias, act, out_dtype)
        x = interleave_phases(y, N, H, W, Co)

    return jnp.transpose(x, (0, 3, 1, 2))               # NHWC -> NCHW (f32)


# --------------------------------------------------------------------------
# Pure-JAX f32 reference (matches PyTorch semantics) for validation.
# --------------------------------------------------------------------------
def reference_forward(x, weights):
    def deconv(x, w, stride, padding):
        K = w.shape[2]
        rhs = jnp.flip(w, axis=(2, 3)).transpose(1, 0, 2, 3)   # (O, I, kH, kW)
        return jax.lax.conv_general_dilated(
            x, rhs, window_strides=(1, 1),
            padding=[(K - 1 - padding,) * 2] * 2,
            lhs_dilation=(stride, stride),
            dimension_numbers=("NCHW", "OIHW", "NCHW"),
            precision=jax.lax.Precision.HIGHEST)

    def bn(x, p):
        gamma, beta, mean, var = p
        scale = gamma / jnp.sqrt(var + _BN_EPS)
        shift = beta - mean * scale
        return x * scale[None, :, None, None] + shift[None, :, None, None]

    y = jax.nn.relu(bn(deconv(x, weights["dconv1"], 1, 0), weights["bn1"]))
    y = jax.nn.relu(bn(deconv(y, weights["dconv2"], 2, 1), weights["bn2"]))
    y = jax.nn.relu(bn(deconv(y, weights["dconv3"], 2, 1), weights["bn3"]))
    y = jax.nn.relu(bn(deconv(y, weights["dconv4"], 2, 1), weights["bn4"]))
    y = jnp.tanh(deconv(y, weights["dconv5"], 2, 1))
    return y


# --------------------------------------------------------------------------
# Deterministic parameter construction.
# --------------------------------------------------------------------------
def make_weights(params, key):
    nz, ngf, img_c = params["nz"], params["ngf"], params["img_channel"]
    shapes = {
        "dconv1": (nz, ngf * 8, 4, 4),
        "dconv2": (ngf * 8, ngf * 4, 4, 4),
        "dconv3": (ngf * 4, ngf * 2, 4, 4),
        "dconv4": (ngf * 2, ngf, 4, 4),
        "dconv5": (ngf, img_c, 4, 4),
    }
    bn_channels = {"bn1": ngf * 8, "bn2": ngf * 4, "bn3": ngf * 2, "bn4": ngf}
    weights = {}
    keys = jax.random.split(key, len(shapes) + len(bn_channels))
    for i, (name, shp) in enumerate(shapes.items()):
        weights[name] = 0.02 * jax.random.normal(keys[i], shp, jnp.float32)
    for j, (name, c) in enumerate(bn_channels.items()):
        k1, k2, k3, k4 = jax.random.split(keys[len(shapes) + j], 4)
        gamma = 1.0 + 0.1 * jax.random.normal(k1, (c,), jnp.float32)
        beta = 0.1 * jax.random.normal(k2, (c,), jnp.float32)
        mean = 0.1 * jax.random.normal(k3, (c,), jnp.float32)
        var = 1.0 + 0.1 * jnp.abs(jax.random.normal(k4, (c,), jnp.float32))
        weights[name] = (gamma, beta, mean, var)
    return weights


if __name__ == "__main__":
    # Small but structure-preserving configuration.
    params = {"nz": 32, "ngf": 16, "img_channel": 3}
    batch = 2

    root = jax.random.PRNGKey(0)
    k_w, k_x = jax.random.split(root)
    weights = make_weights(params, k_w)
    x = jax.random.normal(k_x, (batch, params["nz"], 1, 1), jnp.float32)

    out = jax.jit(generator_forward)(x, weights)
    out = jax.block_until_ready(out)

    expected_shape = (batch, params["img_channel"], 64, 64)
    assert out.shape == expected_shape, (out.shape, expected_shape)

    ref = jax.block_until_ready(jax.jit(reference_forward)(x, weights))
    np.testing.assert_allclose(np.asarray(out), np.asarray(ref),
                               rtol=5e-2, atol=5e-2)

    print("KERNEL_OK")
</pallas_src>

<mosaic_0001>
module attributes {stable_mosaic.version = 11 : i64} {
  func.func @_fused_matmul_kernel(%arg0: i32, %arg1: i32, %arg2: i32, %arg3: memref<1x16x128xbf16, #tpu.memory_space<vmem>>, %arg4: memref<1x128x256xbf16, #tpu.memory_space<vmem>>, %arg5: memref<1x256xf32, #tpu.memory_space<vmem>>, %arg6: memref<1x256xf32, #tpu.memory_space<vmem>>, %arg7: memref<1x16x256xbf16, #tpu.memory_space<vmem>>) attributes {dimension_semantics = [#tpu.dimension_semantics<parallel>, #tpu.dimension_semantics<parallel>, #tpu.dimension_semantics<parallel>], iteration_bounds = array<i64: 1, 1, 8>, scalar_prefetch = 0 : i64, scratch_operands = 0 : i64, tpu.core_type = #tpu.core_type<tc>, window_params = [{transform_indices = @transform_0, window_bounds = array<i64: 1, 16, 128>}, {transform_indices = @transform_1, window_bounds = array<i64: 1, 128, 256>}, {transform_indices = @transform_2, window_bounds = array<i64: 1, 256>}, {transform_indices = @transform_3, window_bounds = array<i64: 1, 256>}, {transform_indices = @transform_4, window_bounds = array<i64: 1, 16, 256>}]} {
    %c0 = arith.constant 0 : index
    %c0_0 = arith.constant 0 : index
    %c0_1 = arith.constant 0 : index
    %0 = vector.load %arg3[%c0, %c0_0, %c0_1] : memref<1x16x128xbf16, #tpu.memory_space<vmem>>, vector<1x16x128xbf16>
    %1 = vector.shape_cast %0 : vector<1x16x128xbf16> to vector<16x128xbf16>
    %c0_2 = arith.constant 0 : index
    %c0_3 = arith.constant 0 : index
    %c0_4 = arith.constant 0 : index
    %2 = vector.load %arg4[%c0_2, %c0_3, %c0_4] : memref<1x128x256xbf16, #tpu.memory_space<vmem>>, vector<1x128x256xbf16>
    %3 = vector.shape_cast %2 : vector<1x128x256xbf16> to vector<128x256xbf16>
    %cst = arith.constant dense<0.000000e+00> : vector<16x256xf32>
    %4 = tpu.matmul %1, %3, %cst {dimension_numbers = #tpu.dot_dimension_numbers<[1], [0], [0], [1], [0, 0, 1, 1], [], []>} : vector<16x128xbf16>, vector<128x256xbf16>, vector<16x256xf32> -> vector<16x256xf32>
    %c0_5 = arith.constant 0 : index
    %c0_6 = arith.constant 0 : index
    %5 = vector.load %arg5[%c0_5, %c0_6] : memref<1x256xf32, #tpu.memory_space<vmem>>, vector<1x256xf32>
    %6 = vector.broadcast %5 : vector<1x256xf32> to vector<16x256xf32>
    %7 = arith.mulf %4, %6 : vector<16x256xf32>
    %c0_7 = arith.constant 0 : index
    %c0_8 = arith.constant 0 : index
    %8 = vector.load %arg6[%c0_7, %c0_8] : memref<1x256xf32, #tpu.memory_space<vmem>>, vector<1x256xf32>
    %9 = vector.broadcast %8 : vector<1x256xf32> to vector<16x256xf32>
    %10 = arith.addf %7, %9 : vector<16x256xf32>
    %cst_9 = arith.constant 0.000000e+00 : f32
    %11 = vector.broadcast %cst_9 : f32 to vector<16x256xf32>
    %12 = arith.maximumf %10, %11 : vector<16x256xf32>
    %13 = arith.truncf %12 : vector<16x256xf32> to vector<16x256xbf16>
    %c0_10 = arith.constant 0 : index
    %c0_11 = arith.constant 0 : index
    %c0_12 = arith.constant 0 : index
    %14 = vector.load %arg7[%c0_10, %c0_11, %c0_12] : memref<1x16x256xbf16, #tpu.memory_space<vmem>>, vector<1x16x256xbf16>
    %15 = vector.shape_cast %14 : vector<1x16x256xbf16> to vector<16x256xbf16>
    %16 = vector.shape_cast %13 : vector<16x256xbf16> to vector<1x16x256xbf16>
    tpu.vector_store %arg7[%c0_10, %c0_11, %c0_12], %16 {strides = array<i32>} : memref<1x16x256xbf16, #tpu.memory_space<vmem>>, vector<1x16x256xbf16>,
    return
  }
  func.func @transform_0(%arg0: i32, %arg1: i32, %arg2: i32) -> (i32, i32, i32) {
    %c0_i32 = arith.constant 0 : i32
    %c0_i32_0 = arith.constant 0 : i32
    return %arg0, %arg1, %c0_i32 : i32, i32, i32
  }
  func.func @transform_1(%arg0: i32, %arg1: i32, %arg2: i32) -> (i32, i32, i32) {
    %c0_i32 = arith.constant 0 : i32
    %c0_i32_0 = arith.constant 0 : i32
    return %arg0, %c0_i32, %arg2 : i32, i32, i32
  }
  func.func @transform_2(%arg0: i32, %arg1: i32, %arg2: i32) -> (i32, i32) {
    %c0_i32 = arith.constant 0 : i32
    %c0_i32_0 = arith.constant 0 : i32
    return %c0_i32, %arg2 : i32, i32
  }
  func.func @transform_3(%arg0: i32, %arg1: i32, %arg2: i32) -> (i32, i32) {
    %c0_i32 = arith.constant 0 : i32
    %c0_i32_0 = arith.constant 0 : i32
    return %c0_i32, %arg2 : i32, i32
  }
  func.func @transform_4(%arg0: i32, %arg1: i32, %arg2: i32) -> (i32, i32, i32) {
    %c0_i32 = arith.constant 0 : i32
    return %arg0, %arg1, %arg2 : i32, i32, i32
  }
}

module attributes {stable_mosaic.version = 11 : i64} {
  func.func @_fused_matmul_kernel(%arg0: i32, %arg1: i32, %arg2: i32, %arg3: memref<1x32x512xbf16, #tpu.memory_space<vmem>>, %arg4: memref<1x512x128xbf16, #tpu.memory_space<vmem>>, %arg5: memref<1x128xf32, #tpu.memory_space<vmem>>, %arg6: memref<1x128xf32, #tpu.memory_space<vmem>>, %arg7: memref<1x32x128xbf16, #tpu.memory_space<vmem>>) attributes {dimension_semantics = [#tpu.dimension_semantics<parallel>, #tpu.dimension_semantics<parallel>, #tpu.dimension_semantics<parallel>], iteration_bounds = array<i64: 4, 1, 1>, scalar_prefetch = 0 : i64, scratch_operands = 0 : i64, tpu.core_type = #tpu.core_type<tc>, window_params = [{transform_indices = @transform_0, window_bounds = array<i64: 1, 32, 512>}, {transform_indices = @transform_1, window_bounds = array<i64: 1, 512, 128>}, {transform_indices = @transform_2, window_bounds = array<i64: 1, 128>}, {transform_indices = @transform_3, window_bounds = array<i64: 1, 128>}, {transform_indices = @transform_4, window_bounds = array<i64: 1, 32, 128>}]} {
    %c0 = arith.constant 0 : index
    %c0_0 = arith.constant 0 : index
    %c0_1 = arith.constant 0 : index
    %0 = vector.load %arg3[%c0, %c0_0, %c0_1] : memref<1x32x512xbf16, #tpu.memory_space<vmem>>, vector<1x32x512xbf16>
    %1 = vector.shape_cast %0 : vector<1x32x512xbf16> to vector<32x512xbf16>
    %c0_2 = arith.constant 0 : index
    %c0_3 = arith.constant 0 : index
    %c0_4 = arith.constant 0 : index
    %2 = vector.load %arg4[%c0_2, %c0_3, %c0_4] : memref<1x512x128xbf16, #tpu.memory_space<vmem>>, vector<1x512x128xbf16>
    %3 = vector.shape_cast %2 : vector<1x512x128xbf16> to vector<512x128xbf16>
    %cst = arith.constant dense<0.000000e+00> : vector<32x128xf32>
    %4 = tpu.matmul %1, %3, %cst {dimension_numbers = #tpu.dot_dimension_numbers<[1], [0], [0], [1], [0, 0, 1, 1], [], []>} : vector<32x512xbf16>, vector<512x128xbf16>, vector<32x128xf32> -> vector<32x128xf32>
    %c0_5 = arith.constant 0 : index
    %c0_6 = arith.constant 0 : index
    %5 = vector.load %arg5[%c0_5, %c0_6] : memref<1x128xf32, #tpu.memory_space<vmem>>, vector<1x128xf32>
    %6 = vector.broadcast %5 : vector<1x128xf32> to vector<32x128xf32>
    %7 = arith.mulf %4, %6 : vector<32x128xf32>
    %c0_7 = arith.constant 0 : index
    %c0_8 = arith.constant 0 : index
    %8 = vector.load %arg6[%c0_7, %c0_8] : memref<1x128xf32, #tpu.memory_space<vmem>>, vector<1x128xf32>
    %9 = vector.broadcast %8 : vector<1x128xf32> to vector<32x128xf32>
    %10 = arith.addf %7, %9 : vector<32x128xf32>
    %cst_9 = arith.constant 0.000000e+00 : f32
    %11 = vector.broadcast %cst_9 : f32 to vector<32x128xf32>
    %12 = arith.maximumf %10, %11 : vector<32x128xf32>
    %13 = arith.truncf %12 : vector<32x128xf32> to vector<32x128xbf16>
    %c0_10 = arith.constant 0 : index
    %c0_11 = arith.constant 0 : index
    %c0_12 = arith.constant 0 : index
    %14 = vector.load %arg7[%c0_10, %c0_11, %c0_12] : memref<1x32x128xbf16, #tpu.memory_space<vmem>>, vector<1x32x128xbf16>
    %15 = vector.shape_cast %14 : vector<1x32x128xbf16> to vector<32x128xbf16>
    %16 = vector.shape_cast %13 : vector<32x128xbf16> to vector<1x32x128xbf16>
    tpu.vector_store %arg7[%c0_10, %c0_11, %c0_12], %16 {strides = array<i32>} : memref<1x32x128xbf16, #tpu.memory_space<vmem>>, vector<1x32x128xbf16>,
    return
  }
  func.func @transform_0(%arg0: i32, %arg1: i32, %arg2: i32) -> (i32, i32, i32) {
    %c0_i32 = arith.constant 0 : i32
    %c0_i32_0 = arith.constant 0 : i32
    return %arg0, %arg1, %c0_i32 : i32, i32, i32
  }
  func.func @transform_1(%arg0: i32, %arg1: i32, %arg2: i32) -> (i32, i32, i32) {
    %c0_i32 = arith.constant 0 : i32
    %c0_i32_0 = arith.constant 0 : i32
    return %arg0, %c0_i32, %arg2 : i32, i32, i32
  }
  func.func @transform_2(%arg0: i32, %arg1: i32, %arg2: i32) -> (i32, i32) {
    %c0_i32 = arith.constant 0 : i32
    %c0_i32_0 = arith.constant 0 : i32
    return %c0_i32, %arg2 : i32, i32
  }
  func.func @transform_3(%arg0: i32, %arg1: i32, %arg2: i32) -> (i32, i32) {
    %c0_i32 = arith.constant 0 : i32
    %c0_i32_0 = arith.constant 0 : i32
    return %c0_i32, %arg2 : i32, i32
  }
  func.func @transform_4(%arg0: i32, %arg1: i32, %arg2: i32) -> (i32, i32, i32) {
    %c0_i32 = arith.constant 0 : i32
    return %arg0, %arg1, %arg2 : i32, i32, i32
  }
}

module attributes {stable_mosaic.version = 11 : i64} {
  func.func @_fused_matmul_kernel(%arg0: i32, %arg1: i32, %arg2: i32, %arg3: memref<1x128x256xbf16, #tpu.memory_space<vmem>>, %arg4: memref<1x256x128xbf16, #tpu.memory_space<vmem>>, %arg5: memref<1x128xf32, #tpu.memory_space<vmem>>, %arg6: memref<1x128xf32, #tpu.memory_space<vmem>>, %arg7: memref<1x128x128xbf16, #tpu.memory_space<vmem>>) attributes {dimension_semantics = [#tpu.dimension_semantics<parallel>, #tpu.dimension_semantics<parallel>, #tpu.dimension_semantics<parallel>], iteration_bounds = array<i64: 4, 1, 1>, scalar_prefetch = 0 : i64, scratch_operands = 0 : i64, tpu.core_type = #tpu.core_type<tc>, window_params = [{transform_indices = @transform_0, window_bounds = array<i64: 1, 128, 256>}, {transform_indices = @transform_1, window_bounds = array<i64: 1, 256, 128>}, {transform_indices = @transform_2, window_bounds = array<i64: 1, 128>}, {transform_indices = @transform_3, window_bounds = array<i64: 1, 128>}, {transform_indices = @transform_4, window_bounds = array<i64: 1, 128, 128>}]} {
    %c0 = arith.constant 0 : index
    %c0_0 = arith.constant 0 : index
    %c0_1 = arith.constant 0 : index
    %0 = vector.load %arg3[%c0, %c0_0, %c0_1] : memref<1x128x256xbf16, #tpu.memory_space<vmem>>, vector<1x128x256xbf16>
    %1 = vector.shape_cast %0 : vector<1x128x256xbf16> to vector<128x256xbf16>
    %c0_2 = arith.constant 0 : index
    %c0_3 = arith.constant 0 : index
    %c0_4 = arith.constant 0 : index
    %2 = vector.load %arg4[%c0_2, %c0_3, %c0_4] : memref<1x256x128xbf16, #tpu.memory_space<vmem>>, vector<1x256x128xbf16>
    %3 = vector.shape_cast %2 : vector<1x256x128xbf16> to vector<256x128xbf16>
    %cst = arith.constant dense<0.000000e+00> : vector<128x128xf32>
    %4 = tpu.matmul %1, %3, %cst {dimension_numbers = #tpu.dot_dimension_numbers<[1], [0], [0], [1], [0, 0, 1, 1], [], []>} : vector<128x256xbf16>, vector<256x128xbf16>, vector<128x128xf32> -> vector<128x128xf32>
    %c0_5 = arith.constant 0 : index
    %c0_6 = arith.constant 0 : index
    %5 = vector.load %arg5[%c0_5, %c0_6] : memref<1x128xf32, #tpu.memory_space<vmem>>, vector<1x128xf32>
    %6 = vector.broadcast %5 : vector<1x128xf32> to vector<128x128xf32>
    %7 = arith.mulf %4, %6 : vector<128x128xf32>
    %c0_7 = arith.constant 0 : index
    %c0_8 = arith.constant 0 : index
    %8 = vector.load %arg6[%c0_7, %c0_8] : memref<1x128xf32, #tpu.memory_space<vmem>>, vector<1x128xf32>
    %9 = vector.broadcast %8 : vector<1x128xf32> to vector<128x128xf32>
    %10 = arith.addf %7, %9 : vector<128x128xf32>
    %cst_9 = arith.constant 0.000000e+00 : f32
    %11 = vector.broadcast %cst_9 : f32 to vector<128x128xf32>
    %12 = arith.maximumf %10, %11 : vector<128x128xf32>
    %13 = arith.truncf %12 : vector<128x128xf32> to vector<128x128xbf16>
    %c0_10 = arith.constant 0 : index
    %c0_11 = arith.constant 0 : index
    %c0_12 = arith.constant 0 : index
    %14 = vector.load %arg7[%c0_10, %c0_11, %c0_12] : memref<1x128x128xbf16, #tpu.memory_space<vmem>>, vector<1x128x128xbf16>
    %15 = vector.shape_cast %14 : vector<1x128x128xbf16> to vector<128x128xbf16>
    %16 = vector.shape_cast %13 : vector<128x128xbf16> to vector<1x128x128xbf16>
    tpu.vector_store %arg7[%c0_10, %c0_11, %c0_12], %16 {strides = array<i32>} : memref<1x128x128xbf16, #tpu.memory_space<vmem>>, vector<1x128x128xbf16>,
    return
  }
  func.func @transform_0(%arg0: i32, %arg1: i32, %arg2: i32) -> (i32, i32, i32) {
    %c0_i32 = arith.constant 0 : i32
    %c0_i32_0 = arith.constant 0 : i32
    return %arg0, %arg1, %c0_i32 : i32, i32, i32
  }
  func.func @transform_1(%arg0: i32, %arg1: i32, %arg2: i32) -> (i32, i32, i32) {
    %c0_i32 = arith.constant 0 : i32
    %c0_i32_0 = arith.constant 0 : i32
    return %arg0, %c0_i32, %arg2 : i32, i32, i32
  }
  func.func @transform_2(%arg0: i32, %arg1: i32, %arg2: i32) -> (i32, i32) {
    %c0_i32 = arith.constant 0 : i32
    %c0_i32_0 = arith.constant 0 : i32
    return %c0_i32, %arg2 : i32, i32
  }
  func.func @transform_3(%arg0: i32, %arg1: i32, %arg2: i32) -> (i32, i32) {
    %c0_i32 = arith.constant 0 : i32
    %c0_i32_0 = arith.constant 0 : i32
    return %c0_i32, %arg2 : i32, i32
  }
  func.func @transform_4(%arg0: i32, %arg1: i32, %arg2: i32) -> (i32, i32, i32) {
    %c0_i32 = arith.constant 0 : i32
    return %arg0, %arg1, %arg2 : i32, i32, i32
  }
}

module attributes {stable_mosaic.version = 11 : i64} {
  func.func @_fused_matmul_kernel(%arg0: i32, %arg1: i32, %arg2: i32, %arg3: memref<1x512x128xbf16, #tpu.memory_space<vmem>>, %arg4: memref<1x128x128xbf16, #tpu.memory_space<vmem>>, %arg5: memref<1x128xf32, #tpu.memory_space<vmem>>, %arg6: memref<1x128xf32, #tpu.memory_space<vmem>>, %arg7: memref<1x512x128xbf16, #tpu.memory_space<vmem>>) attributes {dimension_semantics = [#tpu.dimension_semantics<parallel>, #tpu.dimension_semantics<parallel>, #tpu.dimension_semantics<parallel>], iteration_bounds = array<i64: 4, 1, 1>, scalar_prefetch = 0 : i64, scratch_operands = 0 : i64, tpu.core_type = #tpu.core_type<tc>, window_params = [{transform_indices = @transform_0, window_bounds = array<i64: 1, 512, 128>}, {transform_indices = @transform_1, window_bounds = array<i64: 1, 128, 128>}, {transform_indices = @transform_2, window_bounds = array<i64: 1, 128>}, {transform_indices = @transform_3, window_bounds = array<i64: 1, 128>}, {transform_indices = @transform_4, window_bounds = array<i64: 1, 512, 128>}]} {
    %c0 = arith.constant 0 : index
    %c0_0 = arith.constant 0 : index
    %c0_1 = arith.constant 0 : index
    %0 = vector.load %arg3[%c0, %c0_0, %c0_1] : memref<1x512x128xbf16, #tpu.memory_space<vmem>>, vector<1x512x128xbf16>
    %1 = vector.shape_cast %0 : vector<1x512x128xbf16> to vector<512x128xbf16>
    %c0_2 = arith.constant 0 : index
    %c0_3 = arith.constant 0 : index
    %c0_4 = arith.constant 0 : index
    %2 = vector.load %arg4[%c0_2, %c0_3, %c0_4] : memref<1x128x128xbf16, #tpu.memory_space<vmem>>, vector<1x128x128xbf16>
    %3 = vector.shape_cast %2 : vector<1x128x128xbf16> to vector<128x128xbf16>
    %cst = arith.constant dense<0.000000e+00> : vector<512x128xf32>
    %4 = tpu.matmul %1, %3, %cst {dimension_numbers = #tpu.dot_dimension_numbers<[1], [0], [0], [1], [0, 0, 1, 1], [], []>} : vector<512x128xbf16>, vector<128x128xbf16>, vector<512x128xf32> -> vector<512x128xf32>
    %c0_5 = arith.constant 0 : index
    %c0_6 = arith.constant 0 : index
    %5 = vector.load %arg5[%c0_5, %c0_6] : memref<1x128xf32, #tpu.memory_space<vmem>>, vector<1x128xf32>
    %6 = vector.broadcast %5 : vector<1x128xf32> to vector<512x128xf32>
    %7 = arith.mulf %4, %6 : vector<512x128xf32>
    %c0_7 = arith.constant 0 : index
    %c0_8 = arith.constant 0 : index
    %8 = vector.load %arg6[%c0_7, %c0_8] : memref<1x128xf32, #tpu.memory_space<vmem>>, vector<1x128xf32>
    %9 = vector.broadcast %8 : vector<1x128xf32> to vector<512x128xf32>
    %10 = arith.addf %7, %9 : vector<512x128xf32>
    %cst_9 = arith.constant 0.000000e+00 : f32
    %11 = vector.broadcast %cst_9 : f32 to vector<512x128xf32>
    %12 = arith.maximumf %10, %11 : vector<512x128xf32>
    %13 = arith.truncf %12 : vector<512x128xf32> to vector<512x128xbf16>
    %c0_10 = arith.constant 0 : index
    %c0_11 = arith.constant 0 : index
    %c0_12 = arith.constant 0 : index
    %14 = vector.load %arg7[%c0_10, %c0_11, %c0_12] : memref<1x512x128xbf16, #tpu.memory_space<vmem>>, vector<1x512x128xbf16>
    %15 = vector.shape_cast %14 : vector<1x512x128xbf16> to vector<512x128xbf16>
    %16 = vector.shape_cast %13 : vector<512x128xbf16> to vector<1x512x128xbf16>
    tpu.vector_store %arg7[%c0_10, %c0_11, %c0_12], %16 {strides = array<i32>} : memref<1x512x128xbf16, #tpu.memory_space<vmem>>, vector<1x512x128xbf16>,
    return
  }
  func.func @transform_0(%arg0: i32, %arg1: i32, %arg2: i32) -> (i32, i32, i32) {
    %c0_i32 = arith.constant 0 : i32
    %c0_i32_0 = arith.constant 0 : i32
    return %arg0, %arg1, %c0_i32 : i32, i32, i32
  }
  func.func @transform_1(%arg0: i32, %arg1: i32, %arg2: i32) -> (i32, i32, i32) {
    %c0_i32 = arith.constant 0 : i32
    %c0_i32_0 = arith.constant 0 : i32
    return %arg0, %c0_i32, %arg2 : i32, i32, i32
  }
  func.func @transform_2(%arg0: i32, %arg1: i32, %arg2: i32) -> (i32, i32) {
    %c0_i32 = arith.constant 0 : i32
    %c0_i32_0 = arith.constant 0 : i32
    return %c0_i32, %arg2 : i32, i32
  }
  func.func @transform_3(%arg0: i32, %arg1: i32, %arg2: i32) -> (i32, i32) {
    %c0_i32 = arith.constant 0 : i32
    %c0_i32_0 = arith.constant 0 : i32
    return %c0_i32, %arg2 : i32, i32
  }
  func.func @transform_4(%arg0: i32, %arg1: i32, %arg2: i32) -> (i32, i32, i32) {
    %c0_i32 = arith.constant 0 : i32
    return %arg0, %arg1, %arg2 : i32, i32, i32
  }
}

module attributes {stable_mosaic.version = 11 : i64} {
  func.func @_fused_matmul_kernel(%arg0: i32, %arg1: i32, %arg2: i32, %arg3: memref<1x512x128xbf16, #tpu.memory_space<vmem>>, %arg4: memref<1x128x128xbf16, #tpu.memory_space<vmem>>, %arg5: memref<1x128xf32, #tpu.memory_space<vmem>>, %arg6: memref<1x128xf32, #tpu.memory_space<vmem>>, %arg7: memref<1x512x128xf32, #tpu.memory_space<vmem>>) attributes {dimension_semantics = [#tpu.dimension_semantics<parallel>, #tpu.dimension_semantics<parallel>, #tpu.dimension_semantics<parallel>], iteration_bounds = array<i64: 4, 4, 1>, scalar_prefetch = 0 : i64, scratch_operands = 0 : i64, tpu.core_type = #tpu.core_type<tc>, window_params = [{transform_indices = @transform_0, window_bounds = array<i64: 1, 512, 128>}, {transform_indices = @transform_1, window_bounds = array<i64: 1, 128, 128>}, {transform_indices = @transform_2, window_bounds = array<i64: 1, 128>}, {transform_indices = @transform_3, window_bounds = array<i64: 1, 128>}, {transform_indices = @transform_4, window_bounds = array<i64: 1, 512, 128>}]} {
    %c0 = arith.constant 0 : index
    %c0_0 = arith.constant 0 : index
    %c0_1 = arith.constant 0 : index
    %0 = vector.load %arg3[%c0, %c0_0, %c0_1] : memref<1x512x128xbf16, #tpu.memory_space<vmem>>, vector<1x512x128xbf16>
    %1 = vector.shape_cast %0 : vector<1x512x128xbf16> to vector<512x128xbf16>
    %c0_2 = arith.constant 0 : index
    %c0_3 = arith.constant 0 : index
    %c0_4 = arith.constant 0 : index
    %2 = vector.load %arg4[%c0_2, %c0_3, %c0_4] : memref<1x128x128xbf16, #tpu.memory_space<vmem>>, vector<1x128x128xbf16>
    %3 = vector.shape_cast %2 : vector<1x128x128xbf16> to vector<128x128xbf16>
    %cst = arith.constant dense<0.000000e+00> : vector<512x128xf32>
    %4 = tpu.matmul %1, %3, %cst {dimension_numbers = #tpu.dot_dimension_numbers<[1], [0], [0], [1], [0, 0, 1, 1], [], []>} : vector<512x128xbf16>, vector<128x128xbf16>, vector<512x128xf32> -> vector<512x128xf32>
    %c0_5 = arith.constant 0 : index
    %c0_6 = arith.constant 0 : index
    %5 = vector.load %arg5[%c0_5, %c0_6] : memref<1x128xf32, #tpu.memory_space<vmem>>, vector<1x128xf32>
    %6 = vector.broadcast %5 : vector<1x128xf32> to vector<512x128xf32>
    %7 = arith.mulf %4, %6 : vector<512x128xf32>
    %c0_7 = arith.constant 0 : index
    %c0_8 = arith.constant 0 : index
    %8 = vector.load %arg6[%c0_7, %c0_8] : memref<1x128xf32, #tpu.memory_space<vmem>>, vector<1x128xf32>
    %9 = vector.broadcast %8 : vector<1x128xf32> to vector<512x128xf32>
    %10 = arith.addf %7, %9 : vector<512x128xf32>
    %11 = math.tanh %10 : vector<512x128xf32>
    %c0_9 = arith.constant 0 : index
    %c0_10 = arith.constant 0 : index
    %c0_11 = arith.constant 0 : index
    %12 = vector.load %arg7[%c0_9, %c0_10, %c0_11] : memref<1x512x128xf32, #tpu.memory_space<vmem>>, vector<1x512x128xf32>
    %13 = vector.shape_cast %12 : vector<1x512x128xf32> to vector<512x128xf32>
    %14 = vector.shape_cast %11 : vector<512x128xf32> to vector<1x512x128xf32>
    tpu.vector_store %arg7[%c0_9, %c0_10, %c0_11], %14 {strides = array<i32>} : memref<1x512x128xf32, #tpu.memory_space<vmem>>, vector<1x512x128xf32>,
    return
  }
  func.func @transform_0(%arg0: i32, %arg1: i32, %arg2: i32) -> (i32, i32, i32) {
    %c0_i32 = arith.constant 0 : i32
    %c0_i32_0 = arith.constant 0 : i32
    return %arg0, %arg1, %c0_i32 : i32, i32, i32
  }
  func.func @transform_1(%arg0: i32, %arg1: i32, %arg2: i32) -> (i32, i32, i32) {
    %c0_i32 = arith.constant 0 : i32
    %c0_i32_0 = arith.constant 0 : i32
    return %arg0, %c0_i32, %arg2 : i32, i32, i32
  }
  func.func @transform_2(%arg0: i32, %arg1: i32, %arg2: i32) -> (i32, i32) {
    %c0_i32 = arith.constant 0 : i32
    %c0_i32_0 = arith.constant 0 : i32
    return %c0_i32, %arg2 : i32, i32
  }
  func.func @transform_3(%arg0: i32, %arg1: i32, %arg2: i32) -> (i32, i32) {
    %c0_i32 = arith.constant 0 : i32
    %c0_i32_0 = arith.constant 0 : i32
    return %c0_i32, %arg2 : i32, i32
  }
  func.func @transform_4(%arg0: i32, %arg1: i32, %arg2: i32) -> (i32, i32, i32) {
    %c0_i32 = arith.constant 0 : i32
    return %arg0, %arg1, %arg2 : i32, i32, i32
  }
}

</mosaic_0001>

<bundles_post_ra>
// kernel: tile.13
= control target key start
LH: loop header
LB: loop body
LE: loop exit
PB: predicated region body
PF: predicated region fallthrough
CT: control target
= control target key end

     0   :  { %s28_s0 = inlined_call_operand.vmem [shape: f32[128], index: 0, kind: input, shape index: {}]   ;;  %s29_s1 = inlined_call_operand.vmem [shape: f32[16,128], index: 1, kind: output, shape index: {}]  }
   0x1   :  { %v4_v0 = vld [vmem:[%s28_s0] ss:$0 sm:$0xff] }
   0x2   :  { %5 = vst [vmem:[%s29_s1] sm:$0xff] %v4_v0  ;;  %8 = vst [vmem:[%s29_s1 + $0x8] sm:$0xff] %v4_v0 }

// kernel: squeeze.65
= control target key start
LH: loop header
LB: loop body
LE: loop exit
PB: predicated region body
PF: predicated region fallthrough
CT: control target
= control target key end

     0   :  { %v450_v51 = vmov 0.0   ;;  %s533_s0 = inlined_call_operand.vmem [shape: bf16[1,2,2048], index: 0, kind: input, shape index: {}]   ;;  %s534_s1 = inlined_call_operand.vmem [shape: bf16[2,4,4,128], index: 1, kind: output, shape index: {}]  }
   0x1   :  { %v427_v0 = vld [vmem:[%s533_s0 + $0xf] sm:$0x1]  ;;  %v428_v1 = vld [vmem:[%s533_s0 + $0xe] sm:$0x1]  ;;  %v429_v2 = vld [vmem:[%s533_s0 + $0xd] sm:$0x1] }
   0x2   :  { %v17_v3 = vunpack.c.l.bf16 %v427_v0  ;;  %v33_v4 = vunpack.c.l.bf16 %v428_v1  ;;  %v49_v5 = vunpack.c.l.bf16 %v429_v2  ;;  %v430_v6 = vld [vmem:[%s533_s0 + $0xc] sm:$0x1]  ;;  %v431_v7 = vld [vmem:[%s533_s0 + $0xb] sm:$0x1]  ;;  %v432_v8 = vld [vmem:[%s533_s0 + $0xa] sm:$0x1] }
   0x3   :  { %v65_v9 = vunpack.c.l.bf16 %v430_v6  ;;  %v81_v10 = vunpack.c.l.bf16 %v431_v7  ;;  %v97_v11 = vunpack.c.l.bf16 %v432_v8  ;;  %v433_v12 = vld [vmem:[%s533_s0 + $0x9] sm:$0x1]  ;;  %v434_v13 = vld [vmem:[%s533_s0 + $0x8] sm:$0x1]  ;;  %v435_v14 = vld [vmem:[%s533_s0 + $0x7] sm:$0x1] }
   0x4   :  { %20 = vst [vmem:[#allocation1 + $0x78] sm:$0x3] %v17_v3  ;;  %36 = vst [vmem:[#allocation1 + $0x70] sm:$0x3] %v33_v4  ;;  %v113_v15 = vunpack.c.l.bf16 %v433_v12  ;;  %v129_v16 = vunpack.c.l.bf16 %v434_v13  ;;  %v145_v17 = vunpack.c.l.bf16 %v435_v14  ;;  %v436_v18 = vld [vmem:[%s533_s0 + $0x6] sm:$0x1] }
   0x5   :  { %52 = vst [vmem:[#allocation1 + $0x68] sm:$0x3] %v49_v5  ;;  %v437_v19 = vld [vmem:[%s533_s0 + $0x5] sm:$0x1]  ;;  %v438_v20 = vld [vmem:[%s533_s0 + $0x4] sm:$0x1]  ;;  %v161_v21 = vunpack.c.l.bf16 %v436_v18 }
   0x6   :  { %68 = vst [vmem:[#allocation1 + $0x60] sm:$0x3] %v65_v9  ;;  %84 = vst [vmem:[#allocation1 + $0x58] sm:$0x3] %v81_v10  ;;  %v177_v22 = vunpack.c.l.bf16 %v437_v19  ;;  %v193_v23 = vunpack.c.l.bf16 %v438_v20  ;;  %v439_v24 = vld [vmem:[%s533_s0 + $0x3] sm:$0x1] }
   0x7   :  { %100 = vst [vmem:[#allocation1 + $0x50] sm:$0x3] %v97_v11  ;;  %v440_v25 = vld [vmem:[%s533_s0 + $0x2] sm:$0x1]  ;;  %v441_v26 = vld [vmem:[%s533_s0 + $0x1] sm:$0x1]  ;;  %v209_v27 = vunpack.c.l.bf16 %v439_v24 }
   0x8   :  { %116 = vst [vmem:[#allocation1 + $0x48] sm:$0x3] %v113_v15  ;;  %132 = vst [vmem:[#allocation1 + $0x40] sm:$0x3] %v129_v16  ;;  %v225_v28 = vunpack.c.l.bf16 %v440_v25  ;;  %v240_v29 = vunpack.c.l.bf16 %v441_v26  ;;  %v253_v30 = vld [vmem:[%s533_s0] sm:$0x1] }
   0x9   :  { %148 = vst [vmem:[#allocation1 + $0x38] sm:$0x3] %v145_v17  ;;  %164 = vst [vmem:[#allocation1 + $0x30] sm:$0x3] %v161_v21  ;;  %v254_v31 = vunpack.c.l.bf16 %v253_v30 }
   0xa   :  { %180 = vst [vmem:[#allocation1 + $0x28] sm:$0x3] %v177_v22  ;;  %196 = vst [vmem:[#allocation1 + $0x20] sm:$0x3] %v193_v23 }
   0xb   :  { %212 = vst [vmem:[#allocation1 + $0x18] sm:$0x3] %v209_v27  ;;  %228 = vst [vmem:[#allocation1 + $0x10] sm:$0x3] %v225_v28  ;;  %v340_v33 = vld [vmem:[#allocation1 + $0x70] sm:$0x3]  }
   0xc   :  { %243 = vst [vmem:[#allocation1 + $0x8] sm:$0x3] %v240_v29  ;;  %256 = vst [vmem:[#allocation1] sm:$0x3] %v254_v31  ;;  %v334_v32 = vld [vmem:[#allocation1 + $0x68] sm:$0x3]  }
   0xd   :  { %v346_v34 = vld [vmem:[#allocation1 + $0x78] sm:$0x3]   ;;  %v328_v37 = vld [vmem:[#allocation1 + $0x60] sm:$0x3]   ;;  %336 = vst [vmem:[#allocation0 + $0x19] sm:$0x1] %v334_v32  }
   0xe   :  { %v316_v35 = vld [vmem:[#allocation1 + $0x50] sm:$0x3]   ;;  %v322_v36 = vld [vmem:[#allocation1 + $0x58] sm:$0x3]   ;;  %338 = vst [vmem:[#allocation0 + $0x38] sm:$0x2] %v334_v32  }
   0xf   :  { %342 = vst [vmem:[#allocation0 + $0x1a] sm:$0x1] %v340_v33   ;;  %344 = vst [vmem:[#allocation0 + $0x39] sm:$0x2] %v340_v33   ;;  %v304_v39 = vld [vmem:[#allocation1 + $0x40] sm:$0x3]  }
  0x10   :  { %348 = vst [vmem:[#allocation0 + $0x1b] sm:$0x1] %v346_v34   ;;  %350 = vst [vmem:[#allocation0 + $0x3a] sm:$0x2] %v346_v34   ;;  %v298_v38 = vld [vmem:[#allocation1 + $0x38] sm:$0x3]  }
  0x11   :  { %v310_v40 = vld [vmem:[#allocation1 + $0x48] sm:$0x3]   ;;  %318 = vst [vmem:[#allocation0 + $0x12] sm:$0x1] %v316_v35   ;;  %320 = vst [vmem:[#allocation0 + $0x31] sm:$0x2] %v316_v35  }
  0x12   :  { %324 = vst [vmem:[#allocation0 + $0x13] sm:$0x1] %v322_v36   ;;  %326 = vst [vmem:[#allocation0 + $0x32] sm:$0x2] %v322_v36   ;;  %v280_v41 = vld [vmem:[#allocation1 + $0x20] sm:$0x3]  }
  0x13   :  { %330 = vst [vmem:[#allocation0 + $0x18] sm:$0x1] %v328_v37   ;;  %332 = vst [vmem:[#allocation0 + $0x37] sm:$0x2] %v328_v37   ;;  %v286_v42 = vld [vmem:[#allocation1 + $0x28] sm:$0x3]  }
  0x14   :  { %v292_v43 = vld [vmem:[#allocation1 + $0x30] sm:$0x3]   ;;  %300 = vst [vmem:[#allocation0 + $0xb] sm:$0x1] %v298_v38   ;;  %302 = vst [vmem:[#allocation0 + $0x2a] sm:$0x2] %v298_v38  }
  0x15   :  { %306 = vst [vmem:[#allocation0 + $0x10] sm:$0x1] %v304_v39   ;;  %308 = vst [vmem:[#allocation0 + $0x2f] sm:$0x2] %v304_v39   ;;  %v262_v44 = vld [vmem:[#allocation1 + $0x8] sm:$0x3]  }
  0x16   :  { %312 = vst [vmem:[#allocation0 + $0x11] sm:$0x1] %v310_v40   ;;  %314 = vst [vmem:[#allocation0 + $0x30] sm:$0x2] %v310_v40   ;;  %v268_v45 = vld [vmem:[#allocation1 + $0x10] sm:$0x3]  }
  0x17   :  { %v274_v46 = vld [vmem:[#allocation1 + $0x18] sm:$0x3]   ;;  %282 = vst [vmem:[#allocation0 + $0x8] sm:$0x1] %v280_v41   ;;  %284 = vst [vmem:[#allocation0 + $0x27] sm:$0x2] %v280_v41  }
  0x18   :  { %288 = vst [vmem:[#allocation0 + $0x9] sm:$0x1] %v286_v42   ;;  %290 = vst [vmem:[#allocation0 + $0x28] sm:$0x2] %v286_v42   ;;  %v257_v47 = vld [vmem:[#allocation1] sm:$0x3]  }
  0x19   :  { %294 = vst [vmem:[#allocation0 + $0xa] sm:$0x1] %v292_v43   ;;  %296 = vst [vmem:[#allocation0 + $0x29] sm:$0x2] %v292_v43  }
  0x1a   :  { %264 = vst [vmem:[#allocation0 + $0x1] sm:$0x1] %v262_v44   ;;  %266 = vst [vmem:[#allocation0 + $0x20] sm:$0x2] %v262_v44   ;;  %v373_v48 = vld [vmem:[#allocation0 + $0x18] sm:$0xf] }
  0x1b   :  { %270 = vst [vmem:[#allocation0 + $0x2] sm:$0x1] %v268_v45   ;;  %272 = vst [vmem:[#allocation0 + $0x21] sm:$0x2] %v268_v45   ;;  %v401_v49 = vld [vmem:[#allocation0 + $0x38] sm:$0xf]  ;;  %v374_v52 = vpack.c.bf16 %v450_v51, %v373_v48 }
  0x1c   :  { %276 = vst [vmem:[#allocation0 + $0x3] sm:$0x1] %v274_v46   ;;  %278 = vst [vmem:[#allocation0 + $0x22] sm:$0x2] %v274_v46   ;;  %v402_v54 = vpack.c.bf16 %v450_v51, %v401_v49 }
  0x1d   :  { %258 = vst [vmem:[#allocation0] sm:$0x1] %v257_v47   ;;  %260 = vst [vmem:[#allocation0 + $0x1f] sm:$0x2] %v257_v47   ;;  %v366_v50 = vld [vmem:[#allocation0 + $0x10] sm:$0xf] }
  0x1e   :  { %v394_v53 = vld [vmem:[#allocation0 + $0x30] sm:$0xf]  ;;  %v367_v56 = vpack.c.bf16 %v450_v51, %v366_v50  ;;  %444 = vst [vmem:[%s534_s1 + $0x6] sm:$0x3] %v374_v52  ;;  %448 = vst [vmem:[%s534_s1 + $0xe] sm:$0x3] %v402_v54 }
  0x1f   :  { %v395_v58 = vpack.c.bf16 %v450_v51, %v394_v53 }
  0x20   :  { %v360_v55 = vld [vmem:[#allocation0 + $0x8] sm:$0xf]  ;;  %443 = vst [vmem:[%s534_s1 + $0x4] sm:$0x3] %v367_v56 }
  0x21   :  { %v387_v57 = vld [vmem:[#allocation0 + $0x28] sm:$0xf]  ;;  %v361_v59 = vpack.c.bf16 %v450_v51, %v360_v55  ;;  %447 = vst [vmem:[%s534_s1 + $0xc] sm:$0x3] %v395_v58 }
  0x22   :  { %v388_v60 = vpack.c.bf16 %v450_v51, %v387_v57 }
  0x23   :  { %442 = vst [vmem:[%s534_s1 + $0x2] sm:$0x3] %v361_v59 }
  0x24   :  { %v355_v61 = vld [vmem:[#allocation0] sm:$0xf]  ;;  %446 = vst [vmem:[%s534_s1 + $0xa] sm:$0x3] %v388_v60 }
  0x25   :  { %v380_v62 = vld [vmem:[#allocation0 + $0x20] sm:$0xf]  ;;  %v356_v63 = vpack.c.bf16 %v450_v51, %v355_v61 }
  0x26   :  { %v381_v0 = vpack.c.bf16 %v450_v51, %v380_v62 }
  0x27   :  { %358 = vst [vmem:[%s534_s1] sm:$0x3] %v356_v63 }
  0x28   :  { %445 = vst [vmem:[%s534_s1 + $0x8] sm:$0x3] %v381_v0 }

// kernel: generator_forward.5
= control target key start
LH: loop header
LB: loop body
LE: loop exit
PB: predicated region body
PF: predicated region fallthrough
CT: control target
= control target key end

     0   :  { %s928_s15 = smov 0   ;;  %s930_s16 = smov 0   ;;  %s1032_s0 = inlined_call_operand.vmem [shape: bf16[1,16,128], index: 0, kind: input, shape index: {}]   ;;  %s1033_s1 = inlined_call_operand.vmem [shape: bf16[1,128,2048], index: 1, kind: input, shape index: {}]   ;;  %s1034_s2 = inlined_call_operand.vmem [shape: f32[1,2048], index: 2, kind: input, shape index: {}]   ;;  %s1035_s3 = inlined_call_operand.vmem [shape: f32[1,2048], index: 3, kind: input, shape index: {}]   ;;  %s1036_s4 = inlined_call_operand.vmem [shape: bf16[1,16,2048], index: 4, kind: output, shape index: {}]  }
   0x1   :  { %s932_s17 = smov 0   ;;  %s934_s18 = smov 0  }
   0x2   :  { %s936_s19 = smov 0  }
   0x3 LB: > { %s26_s20 = sadd.s32 1, %s896_s18  ;;  %s755_s21 = sadd.s32 4294967295, %s900_s19   ;;  %s900_s19 = sphi %s936_s19, %s14_s19   ;;  %s896_s18 = sphi %s934_s18, %s1041_s18   ;;  %s892_s17 = sphi %s932_s17, %s1040_s17   ;;  %s888_s16 = sphi %s930_s16, %s1039_s16   ;;  %s884_s15 = sphi %s928_s15, %s1038_s15  }
   0x4   : > { %p27_p0 = scmp.ge.s32.totalorder %s26_s20, 8  ;;  %p77_p1 = scmp.ne.s32.totalorder %s888_s16, %s884_s15 }
   0x5   : > { %p78_p2 = scmp.eq.s32.totalorder %s900_s19, 0  ;;  %p163_p4 = scmp.eq.s32.totalorder %s755_s21, 7 }
   0x6   : > { %s1043_s20 = smov (%p27_p0, %s26_s20), 0  ;;  %s70_s23 = sadd.s32 1, %s888_s16 }
   0x7   : > { %p79_p3 = por %p78_p2, %p77_p1  ;;  %s66_s22 = ssub.s32 %s896_s18, %s1043_s20 }
   0x8   : > { %p68_p5 = scmp.eq.s32.totalorder %s66_s22, 0  ;;  %p963_p6 = por %p163_p4, %p77_p1 }
   0x9   : > { %p759_p7 = scmp.ge.s32.totalorder %s900_s19, 8 }
   0xa   : > { %s968_s25 = scalar_select %p68_p5, %s888_s16, %s70_s23  }
   0xb   : > { %198 = sbr.rel (%p759_p7) target bundleno = 38 (0x26), region = 20 }
  0x12   : > { %201 = sbr.rel (!%p79_p3) target bundleno = 38 (0x26), region = 24  ;;  %s203_s26 = sand.u32 (%p79_p3), 1, %s888_s16  }
  0x13   : > { %s792_s27 = sshll.u32 (%p79_p3), %s896_s18, 3  ;;  %s760_s28 = sshll.u32 (%p79_p3), %s203_s26, 7 }
  0x14   : > { %s976_s5 = scalar_lea.vmem (%p79_p3), %s1033_s1, %s792_s27  ;;  %s205_s6 = scalar_lea.vmem (%p79_p3), [#allocation2], %s760_s28 }
  0x15   : > { %v268_v0 = vld [vmem:[%s976_s5] sm:$0xff] (%p79_p3) }
  0x16   : > { %v270_v1 = vld [vmem:[%s976_s5 + $0x40] sm:$0xff] (%p79_p3)  ;;  %269 = vst [vmem:[%s205_s6] sm:$0xff] (%p79_p3), %v268_v0 }
  0x17   : > { %v272_v2 = vld [vmem:[%s976_s5 + $0x80] sm:$0xff] (%p79_p3)  ;;  %271 = vst [vmem:[%s205_s6 + $0x8] sm:$0xff] (%p79_p3), %v270_v1 }
  0x18   : > { %273 = vst [vmem:[%s205_s6 + $0x10] sm:$0xff] (%p79_p3), %v272_v2  ;;  %v274_v3 = vld [vmem:[%s976_s5 + $0xc0] sm:$0xff] (%p79_p3) }
  0x19   : > { %v276_v4 = vld [vmem:[%s976_s5 + $0x100] sm:$0xff]  ;;  %275 = vst [vmem:[%s205_s6 + $0x18] sm:$0xff] %v274_v3 }
  0x1a   : > { %v278_v5 = vld [vmem:[%s976_s5 + $0x140] sm:$0xff]  ;;  %277 = vst [vmem:[%s205_s6 + $0x20] sm:$0xff] %v276_v4 }
  0x1b   : > { %279 = vst [vmem:[%s205_s6 + $0x28] sm:$0xff] %v278_v5  ;;  %v280_v6 = vld [vmem:[%s976_s5 + $0x180] sm:$0xff] }
  0x1c   : > { %v282_v7 = vld [vmem:[%s976_s5 + $0x1c0] sm:$0xff]  ;;  %281 = vst [vmem:[%s205_s6 + $0x30] sm:$0xff] %v280_v6 }
  0x1d   : > { %v284_v8 = vld [vmem:[%s976_s5 + $0x200] sm:$0xff]  ;;  %283 = vst [vmem:[%s205_s6 + $0x38] sm:$0xff] %v282_v7 }
  0x1e   : > { %285 = vst [vmem:[%s205_s6 + $0x40] sm:$0xff] %v284_v8  ;;  %v286_v9 = vld [vmem:[%s976_s5 + $0x240] sm:$0xff] }
  0x1f   : > { %v288_v10 = vld [vmem:[%s976_s5 + $0x280] sm:$0xff]  ;;  %287 = vst [vmem:[%s205_s6 + $0x48] sm:$0xff] %v286_v9 }
  0x20   : > { %v290_v11 = vld [vmem:[%s976_s5 + $0x2c0] sm:$0xff]  ;;  %289 = vst [vmem:[%s205_s6 + $0x50] sm:$0xff] %v288_v10 }
  0x21   : > { %291 = vst [vmem:[%s205_s6 + $0x58] sm:$0xff] %v290_v11  ;;  %v292_v12 = vld [vmem:[%s976_s5 + $0x300] sm:$0xff] }
  0x22   : > { %v294_v13 = vld [vmem:[%s976_s5 + $0x340] sm:$0xff]  ;;  %293 = vst [vmem:[%s205_s6 + $0x60] sm:$0xff] %v292_v12 }
  0x23   : > { %v296_v14 = vld [vmem:[%s976_s5 + $0x380] sm:$0xff]  ;;  %295 = vst [vmem:[%s205_s6 + $0x68] sm:$0xff] %v294_v13 }
  0x24   : > { %297 = vst [vmem:[%s205_s6 + $0x70] sm:$0xff] %v296_v14  ;;  %v298_v15 = vld [vmem:[%s976_s5 + $0x3c0] sm:$0xff] }
  0x25   : > { %299 = vst [vmem:[%s205_s6 + $0x78] sm:$0xff] %v298_v15 }
  0x26 PF: > { %p763_p8 = scmp.ge.s32.totalorder %s900_s19, 1  ;;  %p320_p9 = scmp.lt.s32.totalorder %s900_s19, 9 }
  0x28   : > { %p321_p10 = pnand %p763_p8, %p320_p9 }
  0x29   : > { %s327_s7 = sand.u32 (!%p321_p10), 1, %s884_s15   ;;  %v902_v16 = vmov (!%p321_p10), 0   ;;  %v861_v33 = vld [vmem:[%s1032_s0] sm:$0xff] (!%p321_p10)   ;;  %s766_s12 = sshll.u32 (!%p321_p10), %s892_s17, 1  ;;  %v541_v34 = vlaneseq (!%p321_p10) }
  0x2a   : > { %324 = sbr.rel (%p321_p10) target bundleno = 309 (0x135), region = 70  ;;  %s764_s8 = sshll.u32 (!%p321_p10), %s327_s7, 7  ;;  %528 = vmatprep.mubr.bf16.mxu0 (!%p321_p10), %v902_v16 }
  0x2b   : > { %s329_s9 = scalar_lea.vmem (!%p321_p10), [#allocation2], %s764_s8  ;;  %p380_p11 = scmp.lt.s32.totalorder (!%p321_p10), %s766_s12, 15  ;;  %v542_v35 = vshrl.u32 (!%p321_p10), %v541_v34, 7 }
  0x2c   : > { %v837_v17 = vld [vmem:[%s329_s9 + $0x4] ss:$8 sps:$4 sm:$0xff] (!%p321_p10)   ;;  %v839_v18 = vld [vmem:[%s329_s9] ss:$8 sps:$4 sm:$0xff] (!%p321_p10)   ;;  %v840_v19 = vld [vmem:[%s329_s9 + $0x14] ss:$8 sps:$4 sm:$0xff] (!%p321_p10)  }
  0x2d   : > { %496 = vmatprep.subr.bf16.mxu0 (!%p321_p10), %v837_v17  ;;  %v842_v20 = vld [vmem:[%s329_s9 + $0x10] ss:$8 sps:$4 sm:$0xff] (!%p321_p10)   ;;  %v843_v21 = vld [vmem:[%s329_s9 + $0x24] ss:$8 sps:$4 sm:$0xff] (!%p321_p10)   ;;  %v845_v22 = vld [vmem:[%s329_s9 + $0x20] ss:$8 sps:$4 sm:$0xff] (!%p321_p10)  }
  0x2e   : > { %497 = vmatpush1.bf16.msra.mxu0 (!%p321_p10), %v839_v18  ;;  %v846_v23 = vld [vmem:[%s329_s9 + $0x34] ss:$8 sps:$4 sm:$0xff] (!%p321_p10)   ;;  %v848_v24 = vld [vmem:[%s329_s9 + $0x30] ss:$8 sps:$4 sm:$0xff] (!%p321_p10)   ;;  %v849_v25 = vld [vmem:[%s329_s9 + $0x44] ss:$8 sps:$4 sm:$0xff] (!%p321_p10)  }
  0x2f   : > { %498 = vmatprep.subr.bf16.mxu0 (!%p321_p10), %v840_v19  ;;  %v851_v26 = vld [vmem:[%s329_s9 + $0x40] ss:$8 sps:$4 sm:$0xff] (!%p321_p10)   ;;  %v852_v27 = vld [vmem:[%s329_s9 + $0x54] ss:$8 sps:$4 sm:$0xff] (!%p321_p10)   ;;  %v854_v28 = vld [vmem:[%s329_s9 + $0x50] ss:$8 sps:$4 sm:$0xff] (!%p321_p10)  }
  0x30   : > { %v855_v29 = vld [vmem:[%s329_s9 + $0x64] ss:$8 sps:$4 sm:$0xff] (!%p321_p10)   ;;  %v857_v30 = vld [vmem:[%s329_s9 + $0x60] ss:$8 sps:$4 sm:$0xff] (!%p321_p10)   ;;  %v858_v31 = vld [vmem:[%s329_s9 + $0x74] ss:$8 sps:$4 sm:$0xff] (!%p321_p10)  }
  0x31   : > { %v860_v32 = vld [vmem:[%s329_s9 + $0x70] ss:$8 sps:$4 sm:$0xff]   ;;  %s1045_s12 = smov (!%p380_p11, %s766_s12), 15  ;;  %v543_v36 = vsub.s32 0, %v542_v35  ;;  %v547_v38 = vsub.s32 1, %v542_v35  ;;  %s765_s27 = sshll.u32 %s327_s7, 4 }
  0x32   : > { %499 = vmatpush1.bf16.msra.mxu0 %v842_v20  ;;  %s382_s21 = scalar_lea.vmem %s1034_s2, %s1045_s12  ;;  %s387_s26 = scalar_lea.vmem %s1035_s3, %s1045_s12 }
  0x33   : > { %500 = vmatprep.subr.bf16.mxu0 %v843_v21  ;;  %v539_v37 = vld [vmem:[%s382_s21] sm:$0x3]  ;;  %s367_s28 = scalar_lea.vmem [#allocation3], %s765_s27  ;;  %s795_s29 = sshll.u32 (%p963_p6), %s892_s17, 3 }
  0x34   : > { %v555_v39 = vld [vmem:[%s387_s26] sm:$0x3]  ;;  %v544_v40 = vrot.slane %v539_v37, %v543_v36  ;;  %v548_v41 = vrot.slane %v539_v37, %v547_v38  ;;  %s603_s5 = scalar_lea.vmem (%p963_p6), %s1036_s4, %s795_s29 }
  0x35   : > { %v560_v42 = vrot.slane %v555_v39, %v543_v36  ;;  %v564_v44 = vrot.slane %v555_v39, %v547_v38 }
  0x36   : > { %501 = vmatpush1.bf16.msra.mxu0 %v845_v22 }
  0x37   : > { %502 = vmatprep.subr.bf16.mxu0 %v846_v23 }
  0x3a   : > { %503 = vmatpush1.bf16.msra.mxu0 %v848_v24 }
  0x3b   : > { %504 = vmatprep.subr.bf16.mxu0 %v849_v25 }
  0x3e   : > { %505 = vmatpush1.bf16.msra.mxu0 %v851_v26 }
  0x3f   : > { %506 = vmatprep.subr.bf16.mxu0 %v852_v27 }
  0x42   : > { %507 = vmatpush1.bf16.msra.mxu0 %v854_v28 }
  0x43   : > { %508 = vmatprep.subr.bf16.mxu0 %v855_v29 }
  0x46   : > { %509 = vmatpush1.bf16.msra.mxu0 %v857_v30 }
  0x47   : > { %510 = vmatprep.subr.bf16.mxu0 %v858_v31 }
  0x4a   : > { %511 = vmatpush1.bf16.msra.mxu0 %v860_v32 }
  0x4d   : > { %529 = vmatmul.mubr.bf16.vlgmr.msra.gmra.mrb[0].mxu0 %v861_v33 }
 0x120   : > { %v530_v43 = vpop.f32.mrb[0].mxu0 }
 0x121   : > { %v551_v45 = vmul.f32 %v544_v40, %v530_v43  ;;  %v532_v46 = vpop.f32.mrb[1].mxu0 }
 0x122   : > { %v552_v47 = vmul.f32 %v548_v41, %v532_v46  ;;  %v534_v48 = vpop.f32.mrb[2].mxu0 }
 0x123   : > { %v567_v49 = vadd.f32 %v560_v42, %v551_v45  ;;  %v553_v50 = vmul.f32 %v544_v40, %v534_v48  ;;  %v536_v51 = vpop.f32.mrb[3].mxu0 }
 0x124   : > { %v568_v52 = vadd.f32 %v564_v44, %v552_v47  ;;  %v554_v53 = vmul.f32 %v548_v41, %v536_v51 }
 0x125   : > { %v571_v54 = vmax.f32 %v567_v49, 0.0  ;;  %v569_v55 = vadd.f32 %v560_v42, %v553_v50 }
 0x126   : > { %v572_v56 = vmax.f32 %v568_v52, 0.0  ;;  %v570_v57 = vadd.f32 %v564_v44, %v554_v53  ;;  %595 = sbr.rel (!%p963_p6) target bundleno = 309 (0x135), region = 78 }
 0x127   : > { %v573_v58 = vmax.f32 %v569_v55, 0.0 }
 0x128   : > { %v793_v59 = vpack.c.bf16 %v572_v56, %v571_v54  ;;  %v574_v60 = vmax.f32 %v570_v57, 0.0 }
 0x12a   : > { %587 = vst [vmem:[%s367_s28] sm:$0xff] %v793_v59  ;;  %v794_v61 = vpack.c.bf16 %v574_v60, %v573_v58 }
 0x12c   : > { %588 = vst [vmem:[%s367_s28 + $0x8] sm:$0xff] %v794_v61 }
 0x131   : > { %v633_v62 = vld [vmem:[%s367_s28] sm:$0xff] }
 0x132   : > { %634 = vst [vmem:[%s603_s5] sm:$0xff] %v633_v62 }
 0x133   : > { %v635_v63 = vld [vmem:[%s367_s28 + $0x8] sm:$0xff] }
 0x134   : > { %636 = vst [vmem:[%s603_s5 + $0x40] sm:$0xff] %v635_v63 }
 0x135 PF: > { %s14_s19 = sadd.s32 1, %s900_s19   ;;  %s1038_s15 = smov %s888_s16 }
 0x136   : > { %p11_p12 = scmp.ge.s32.totalorder %s14_s19, 10   ;;  %s1039_s16 = smov %s968_s25 }
 0x137   : > { %s1040_s17 = smov %s896_s18  ;;  %s1041_s18 = smov %s1043_s20 }
 0x138   :  { %13 = sbr.rel (!%p11_p12) target bundleno = 3 (0x3), region = 156 }

// kernel: generator_forward.6
= control target key start
LH: loop header
LB: loop body
LE: loop exit
PB: predicated region body
PF: predicated region fallthrough
CT: control target
= control target key end

     0   :  { %s1160_s15 = smov 0   ;;  %s1162_s16 = smov 0   ;;  %s1241_s0 = inlined_call_operand.vmem [shape: bf16[4,32,512], index: 0, kind: input, shape index: {}]   ;;  %s1242_s1 = inlined_call_operand.vmem [shape: bf16[4,512,128], index: 1, kind: input, shape index: {}]   ;;  %s1243_s2 = inlined_call_operand.vmem [shape: f32[1,128], index: 2, kind: input, shape index: {}]   ;;  %s1244_s3 = inlined_call_operand.vmem [shape: f32[1,128], index: 3, kind: input, shape index: {}]   ;;  %s1245_s4 = inlined_call_operand.vmem [shape: bf16[4,32,128], index: 4, kind: output, shape index: {}]  }
   0x1   :  { %s1164_s17 = smov 0  }
   0x2 LB: > { %s33_s18 = sadd.s32 1, %s1129_s16  ;;  %p914_p0 = scmp.ge.s32.totalorder %s1133_s17, 1  ;;  %s1133_s17 = sphi %s1164_s17, %s14_s17   ;;  %s1129_s16 = sphi %s1162_s16, %s1247_s16   ;;  %s1125_s15 = sphi %s1160_s15, %s1246_s15  }
   0x3   : > { %p35_p1 = scmp.ge.s32.totalorder %s33_s18, 4  ;;  %p224_p2 = scmp.lt.s32.totalorder %s1133_s17, 5 }
   0x5   : > { %s1249_s18 = smov (%p35_p1, %s33_s18), 0  ;;  %p225_p3 = pnand %p914_p0, %p224_p2 }
   0x6   : > { %p277_p4 = scmp.lt.s32.totalorder (!%p225_p3), %s1125_s15, 3  ;;  %v961_v49 = vld [vmem:[%s1243_s2] ss:$0 sm:$0xff] (!%p225_p3) }
   0x7   : > { %228 = sbr.rel (%p225_p3) target bundleno = 288 (0x120), region = 36  ;;  %v962_v54 = vld [vmem:[%s1244_s3] ss:$0 sm:$0xff] (!%p225_p3) }
   0xe   : > { %s1251_s15 = smov (!%p277_p4, %s1125_s15), 3 }
   0xf   : > { %s970_s19 = sshll.u32 %s1251_s15, 8  ;;  %s969_s23 = sshll.u32 %s1251_s15, 6 }
  0x10   : > { %s1184_s22 = scalar_lea.vmem %s1242_s1, %s970_s19  ;;  %s285_s26 = scalar_lea.vmem %s1241_s0, %s969_s23 }
  0x11   : > { %v1067_v0 = vld [vmem:[%s1184_s22 + $0x40] sm:$0xff]   ;;  %v1071_v4 = vld [vmem:[%s1184_s22 + $0x48] sm:$0xff]   ;;  %v1075_v8 = vld [vmem:[%s1184_s22 + $0x50] sm:$0xff]   ;;  %s971_s5 = sshll.u32 %s1251_s15, 4 }
  0x12   : > { %v1068_v1 = vld [vmem:[%s1184_s22 + $0xc0] sm:$0xff]   ;;  %987 = vmatprep.subr.bf16.mxu0 %v1067_v0  ;;  %v1072_v5 = vld [vmem:[%s1184_s22 + $0xc8] sm:$0xff]   ;;  %v1076_v9 = vld [vmem:[%s1184_s22 + $0xd0] sm:$0xff]   ;;  %s312_s8 = scalar_lea.vmem %s1245_s4, %s971_s5 }
  0x13   : > { %v1069_v2 = vld [vmem:[%s1184_s22] sm:$0xff]   ;;  %1015 = vmatprep.subr.bf16.mxu1 %v1068_v1  ;;  %v1073_v6 = vld [vmem:[%s1184_s22 + $0x8] sm:$0xff]   ;;  %v1077_v10 = vld [vmem:[%s1184_s22 + $0x10] sm:$0xff]  }
  0x14   : > { %v1070_v3 = vld [vmem:[%s1184_s22 + $0x80] sm:$0xff]   ;;  %988 = vmatpush3.bf16.msra.mxu0 %v1069_v2  ;;  %v1074_v7 = vld [vmem:[%s1184_s22 + $0x88] sm:$0xff]   ;;  %v1078_v11 = vld [vmem:[%s1184_s22 + $0x90] sm:$0xff]  }
  0x15   : > { %1016 = vmatpush3.bf16.msra.mxu1 %v1070_v3  ;;  %989 = vmatprep.subr.bf16.mxu0 %v1071_v4  ;;  %v1079_v12 = vld [vmem:[%s1184_s22 + $0x58] sm:$0xff]   ;;  %v1083_v16 = vld [vmem:[%s1184_s22 + $0x60] sm:$0xff]   ;;  %v1087_v20 = vld [vmem:[%s1184_s22 + $0x68] sm:$0xff]  }
  0x16   : > { %1017 = vmatprep.subr.bf16.mxu1 %v1072_v5  ;;  %v1080_v13 = vld [vmem:[%s1184_s22 + $0xd8] sm:$0xff]   ;;  %v1084_v17 = vld [vmem:[%s1184_s22 + $0xe0] sm:$0xff]   ;;  %v1088_v21 = vld [vmem:[%s1184_s22 + $0xe8] sm:$0xff]  }
  0x17   : > { %v1081_v14 = vld [vmem:[%s1184_s22 + $0x18] sm:$0xff]   ;;  %v1085_v18 = vld [vmem:[%s1184_s22 + $0x20] sm:$0xff]   ;;  %v1089_v22 = vld [vmem:[%s1184_s22 + $0x28] sm:$0xff]  }
  0x18   : > { %990 = vmatpush3.bf16.msra.mxu0 %v1073_v6  ;;  %v1082_v15 = vld [vmem:[%s1184_s22 + $0x98] sm:$0xff]   ;;  %v1086_v19 = vld [vmem:[%s1184_s22 + $0xa0] sm:$0xff]   ;;  %v1090_v23 = vld [vmem:[%s1184_s22 + $0xa8] sm:$0xff]  }
  0x19   : > { %1018 = vmatpush3.bf16.msra.mxu1 %v1074_v7  ;;  %991 = vmatprep.subr.bf16.mxu0 %v1075_v8  ;;  %v1091_v24 = vld [vmem:[%s1184_s22 + $0x70] sm:$0xff]   ;;  %v1095_v28 = vld [vmem:[%s1184_s22 + $0x78] sm:$0xff]  }
  0x1a   : > { %1019 = vmatprep.subr.bf16.mxu1 %v1076_v9  ;;  %v1092_v25 = vld [vmem:[%s1184_s22 + $0xf0] sm:$0xff]   ;;  %v1096_v29 = vld [vmem:[%s1184_s22 + $0xf8] sm:$0xff]  }
  0x1b   : > { %v1093_v26 = vld [vmem:[%s1184_s22 + $0x30] sm:$0xff]   ;;  %v1097_v30 = vld [vmem:[%s1184_s22 + $0x38] sm:$0xff]  }
  0x1c   : > { %992 = vmatpush3.bf16.msra.mxu0 %v1077_v10  ;;  %v1094_v27 = vld [vmem:[%s1184_s22 + $0xb0] sm:$0xff]   ;;  %v1098_v31 = vld [vmem:[%s1184_s22 + $0xb8] sm:$0xff]  }
  0x1d   : > { %1020 = vmatpush3.bf16.msra.mxu1 %v1078_v11  ;;  %993 = vmatprep.subr.bf16.mxu0 %v1079_v12  ;;  %v1099_v32 = vld [vmem:[%s285_s26] ss:$16 sps:$4 sm:$0xff]   ;;  %v1101_v33 = vld [vmem:[%s285_s26 + $0x4] ss:$16 sps:$4 sm:$0xff]   ;;  %v1102_v34 = vld [vmem:[%s285_s26 + $0x8] ss:$16 sps:$4 sm:$0xff]  }
  0x1e   : > { %1021 = vmatprep.subr.bf16.mxu1 %v1080_v13  ;;  %v1104_v35 = vld [vmem:[%s285_s26 + $0xc] ss:$16 sps:$4 sm:$0xff]   ;;  %651 = vmatprep.mubr.bf16.mxu0 %v1101_v33  ;;  %v1105_v36 = vld [vmem:[%s285_s26 + $0x24] ss:$16 sps:$4 sm:$0xff]   ;;  %v1109_v38 = vld [vmem:[%s285_s26 + $0x20] ss:$16 sps:$4 sm:$0xff]  }
  0x1f   : > { %700 = vmatprep.mubr.bf16.mxu1 %v1104_v35  ;;  %v1107_v37 = vld [vmem:[%s285_s26 + $0x2c] ss:$16 sps:$4 sm:$0xff]   ;;  %v1110_v39 = vld [vmem:[%s285_s26 + $0x28] ss:$16 sps:$4 sm:$0xff]  }
  0x20   : > { %994 = vmatpush3.bf16.msra.mxu0 %v1081_v14 }
  0x21   : > { %1022 = vmatpush3.bf16.msra.mxu1 %v1082_v15  ;;  %995 = vmatprep.subr.bf16.mxu0 %v1083_v16 }
  0x22   : > { %1023 = vmatprep.subr.bf16.mxu1 %v1084_v17 }
  0x24   : > { %996 = vmatpush3.bf16.msra.mxu0 %v1085_v18 }
  0x25   : > { %1024 = vmatpush3.bf16.msra.mxu1 %v1086_v19  ;;  %997 = vmatprep.subr.bf16.mxu0 %v1087_v20 }
  0x26   : > { %1025 = vmatprep.subr.bf16.mxu1 %v1088_v21 }
  0x28   : > { %998 = vmatpush3.bf16.msra.mxu0 %v1089_v22 }
  0x29   : > { %1026 = vmatpush3.bf16.msra.mxu1 %v1090_v23  ;;  %999 = vmatprep.subr.bf16.mxu0 %v1091_v24 }
  0x2a   : > { %1027 = vmatprep.subr.bf16.mxu1 %v1092_v25 }
  0x2c   : > { %1000 = vmatpush3.bf16.msra.mxu0 %v1093_v26 }
  0x2d   : > { %1028 = vmatpush3.bf16.msra.mxu1 %v1094_v27  ;;  %1001 = vmatprep.subr.bf16.mxu0 %v1095_v28 }
  0x2e   : > { %1029 = vmatprep.subr.bf16.mxu1 %v1096_v29 }
  0x30   : > { %1002 = vmatpush3.bf16.msra.mxu0 %v1097_v30 }
  0x31   : > { %1030 = vmatpush3.bf16.msra.mxu1 %v1098_v31 }
  0x33   : > { %652 = vmatmul.mubr.bf16.vlgmr.msra.gmra.mrb[0].mxu0 %v1099_v32 }
  0x34   : > { %701 = vmatmul.mubr.bf16.vlgmr.msra.gmra.mrb[0].mxu1 %v1102_v34  ;;  %659 = vmatprep.mubr.bf16.mxu0 %v1105_v36 }
  0x35   : > { %708 = vmatprep.mubr.bf16.mxu1 %v1107_v37 }
  0x3b   : > { %660 = vmatmul.mubr.bf16.gmra.mrb[4].mxu0 %v1109_v38 }
  0x3c   : > { %709 = vmatmul.mubr.bf16.gmra.mrb[4].mxu1 %v1110_v39 }
 0x106   : > { %v1003_v40 = vpop.f32.mrb[0].mxu0 }
 0x107   : > { %v1031_v41 = vpop.f32.mrb[0].mxu1  ;;  %v1004_v42 = vpop.f32.mrb[1].mxu0 }
 0x108   : > { %v1005_v43 = vadd.f32 %v1004_v42, %v1003_v40  ;;  %v1032_v44 = vpop.f32.mrb[1].mxu1  ;;  %v1006_v45 = vpop.f32.mrb[2].mxu0 }
 0x109   : > { %v1033_v46 = vadd.f32 %v1032_v44, %v1031_v41  ;;  %v1034_v47 = vpop.f32.mrb[2].mxu1  ;;  %v1007_v48 = vpop.f32.mrb[3].mxu0 }
 0x10a   : > { %v1008_v50 = vadd.f32 %v1007_v48, %v1006_v45  ;;  %v1035_v51 = vpop.f32.mrb[3].mxu1 }
 0x10b   : > { %v703_v52 = vadd.f32 %v1033_v46, %v1005_v43  ;;  %v1036_v53 = vadd.f32 %v1035_v51, %v1034_v47 }
 0x10d   : > { %v724_v55 = vmul.f32 %v961_v49, %v703_v52  ;;  %v706_v56 = vadd.f32 %v1036_v53, %v1008_v50 }
 0x10e   : > { %v1009_v57 = vpop.f32.mrb[4].mxu0 }
 0x10f   : > { %v735_v58 = vadd.f32 %v962_v54, %v724_v55  ;;  %v725_v59 = vmul.f32 %v961_v49, %v706_v56  ;;  %v1037_v60 = vpop.f32.mrb[4].mxu1  ;;  %v1010_v61 = vpop.f32.mrb[5].mxu0 }
 0x110   : > { %v1011_v62 = vadd.f32 %v1010_v61, %v1009_v57  ;;  %v1038_v63 = vpop.f32.mrb[5].mxu1  ;;  %v1012_v0 = vpop.f32.mrb[6].mxu0 }
 0x111   : > { %v736_v1 = vadd.f32 %v962_v54, %v725_v59  ;;  %v1039_v2 = vadd.f32 %v1038_v63, %v1037_v60  ;;  %v1040_v3 = vpop.f32.mrb[6].mxu1  ;;  %v1013_v4 = vpop.f32.mrb[7].mxu0  ;;  %v739_v7 = vmax.f32 %v735_v58, 0.0 }
 0x112   : > { %v1014_v5 = vadd.f32 %v1013_v4, %v1012_v0  ;;  %v1041_v6 = vpop.f32.mrb[7].mxu1 }
 0x113   : > { %v740_v8 = vmax.f32 %v736_v1, 0.0  ;;  %v711_v9 = vadd.f32 %v1039_v2, %v1011_v62  ;;  %v1042_v10 = vadd.f32 %v1041_v6, %v1040_v3 }
 0x115   : > { %v979_v11 = vpack.c.bf16 %v740_v8, %v739_v7  ;;  %v726_v12 = vmul.f32 %v961_v49, %v711_v9  ;;  %v714_v13 = vadd.f32 %v1042_v10, %v1014_v5 }
 0x117   : > { %980 = vst [vmem:[%s312_s8] sm:$0xff] %v979_v11   ;;  %v737_v14 = vadd.f32 %v962_v54, %v726_v12  ;;  %v727_v15 = vmul.f32 %v961_v49, %v714_v13 }
 0x119   : > { %v738_v16 = vadd.f32 %v962_v54, %v727_v15  ;;  %v741_v17 = vmax.f32 %v737_v14, 0.0 }
 0x11b   : > { %v742_v18 = vmax.f32 %v738_v16, 0.0 }
 0x11d   : > { %v984_v19 = vpack.c.bf16 %v742_v18, %v741_v17 }
 0x11f   : > { %986 = vst [vmem:[%s312_s8 + $0x8] sm:$0xff] %v984_v19  }
 0x120 PF: > { %s14_s17 = sadd.s32 1, %s1133_s17   ;;  %s1246_s15 = smov %s1129_s16 }
 0x121   : > { %p11_p5 = scmp.ge.s32.totalorder %s14_s17, 6   ;;  %s1247_s16 = smov %s1249_s18 }
 0x123   :  { %13 = sbr.rel (!%p11_p5) target bundleno = 2 (0x2), region = 75 }

// kernel: generator_forward.7
= control target key start
LH: loop header
LB: loop body
LE: loop exit
PB: predicated region body
PF: predicated region fallthrough
CT: control target
= control target key end

     0   :  { %s1247_s15 = smov 0   ;;  %s1249_s16 = smov 0   ;;  %s1375_s0 = inlined_call_operand.vmem [shape: bf16[4,128,256], index: 0, kind: input, shape index: {}]   ;;  %s1376_s1 = inlined_call_operand.vmem [shape: bf16[4,256,128], index: 1, kind: input, shape index: {}]   ;;  %s1377_s2 = inlined_call_operand.vmem [shape: f32[1,128], index: 2, kind: input, shape index: {}]   ;;  %s1378_s3 = inlined_call_operand.vmem [shape: f32[1,128], index: 3, kind: input, shape index: {}]   ;;  %s1379_s4 = inlined_call_operand.vmem [shape: bf16[4,128,128], index: 4, kind: output, shape index: {}]  }
   0x1   :  { %s1251_s17 = smov 0  }
   0x2 LB: > { %s33_s18 = sadd.s32 1, %s1216_s16  ;;  %p929_p0 = scmp.ge.s32.totalorder %s1220_s17, 1  ;;  %s1220_s17 = sphi %s1251_s17, %s14_s17   ;;  %s1216_s16 = sphi %s1249_s16, %s1381_s16   ;;  %s1212_s15 = sphi %s1247_s15, %s1380_s15  }
   0x3   : > { %p35_p1 = scmp.ge.s32.totalorder %s33_s18, 4  ;;  %p224_p2 = scmp.lt.s32.totalorder %s1220_s17, 5 }
   0x5   : > { %s1383_s18 = smov (%p35_p1, %s33_s18), 0  ;;  %p225_p3 = pnand %p929_p0, %p224_p2 }
   0x6   : > { %p277_p4 = scmp.lt.s32.totalorder (!%p225_p3), %s1212_s15, 3  ;;  %v1313_v35 = vld [vmem:[%s1377_s2] ss:$0 sm:$0xff] (!%p225_p3) }
   0x7   : > { %228 = sbr.rel (%p225_p3) target bundleno = 301 (0x12d), region = 36  ;;  %v1318_v41 = vld [vmem:[%s1378_s3] ss:$0 sm:$0xff] (!%p225_p3) }
   0xe   : > { %s1385_s15 = smov (!%p277_p4, %s1212_s15), 3 }
   0xf   : > { %s988_s19 = sshll.u32 %s1385_s15, 7  ;;  %s990_s30 = sshll.u32 %s1385_s15, 6 }
  0x10   : > { %s1271_s22 = scalar_lea.vmem %s1376_s1, %s988_s19  ;;  %s1285_s25 = scalar_lea.vmem %s1375_s0, %s988_s19 }
  0x11   : > { %v1158_v0 = vld [vmem:[%s1271_s22 + $0x40] sm:$0xff]   ;;  %v1160_v2 = vld [vmem:[%s1271_s22 + $0x48] sm:$0xff]   ;;  %v1162_v4 = vld [vmem:[%s1271_s22 + $0x50] sm:$0xff]   ;;  %s1332_s7 = scalar_lea.vmem %s1379_s4, %s990_s30 }
  0x12   : > { %v1159_v1 = vld [vmem:[%s1271_s22] sm:$0xff]   ;;  %1054 = vmatprep.subr.bf16.mxu0 %v1158_v0  ;;  %1118 = vmatprep.subr.bf16.mxu1 %v1158_v0  ;;  %v1161_v3 = vld [vmem:[%s1271_s22 + $0x8] sm:$0xff]   ;;  %v1163_v5 = vld [vmem:[%s1271_s22 + $0x10] sm:$0xff]  }
  0x13   : > { %1055 = vmatpush3.bf16.msra.mxu0 %v1159_v1  ;;  %1126 = vmatpush3.bf16.msra.mxu1 %v1159_v1  ;;  %v1164_v6 = vld [vmem:[%s1271_s22 + $0x58] sm:$0xff]   ;;  %v1166_v8 = vld [vmem:[%s1271_s22 + $0x60] sm:$0xff]   ;;  %v1168_v10 = vld [vmem:[%s1271_s22 + $0x68] sm:$0xff]  }
  0x14   : > { %1056 = vmatprep.subr.bf16.mxu0 %v1160_v2  ;;  %1119 = vmatprep.subr.bf16.mxu1 %v1160_v2  ;;  %v1165_v7 = vld [vmem:[%s1271_s22 + $0x18] sm:$0xff]   ;;  %v1167_v9 = vld [vmem:[%s1271_s22 + $0x20] sm:$0xff]   ;;  %v1169_v13 = vld [vmem:[%s1271_s22 + $0x28] sm:$0xff]  }
  0x15   : > { %v1176_v11 = vld [vmem:[%s1285_s25 + $0x4] ss:$8 sps:$4 sm:$0xff]   ;;  %v1170_v14 = vld [vmem:[%s1271_s22 + $0x70] sm:$0xff]   ;;  %v1172_v16 = vld [vmem:[%s1271_s22 + $0x78] sm:$0xff]  }
  0x16   : > { %v1179_v12 = vld [vmem:[%s1285_s25 + $0x44] ss:$8 sps:$4 sm:$0xff]   ;;  %571 = vmatprep.mubr.bf16.mxu0 %v1176_v11  ;;  %v1171_v15 = vld [vmem:[%s1271_s22 + $0x30] sm:$0xff]   ;;  %v1173_v17 = vld [vmem:[%s1271_s22 + $0x38] sm:$0xff]  }
  0x17   : > { %1057 = vmatpush3.bf16.msra.mxu0 %v1161_v3  ;;  %1127 = vmatpush3.bf16.msra.mxu1 %v1161_v3  ;;  %v1174_v18 = vld [vmem:[%s1285_s25] ss:$8 sps:$4 sm:$0xff]   ;;  %v1180_v20 = vld [vmem:[%s1285_s25 + $0x14] ss:$8 sps:$4 sm:$0xff]   ;;  %v1184_v22 = vld [vmem:[%s1285_s25 + $0x10] ss:$8 sps:$4 sm:$0xff]  }
  0x18   : > { %1058 = vmatprep.subr.bf16.mxu0 %v1162_v4  ;;  %1120 = vmatprep.subr.bf16.mxu1 %v1162_v4  ;;  %v1177_v19 = vld [vmem:[%s1285_s25 + $0x40] ss:$8 sps:$4 sm:$0xff]   ;;  %v1182_v21 = vld [vmem:[%s1285_s25 + $0x54] ss:$8 sps:$4 sm:$0xff]   ;;  %v1185_v23 = vld [vmem:[%s1285_s25 + $0x50] ss:$8 sps:$4 sm:$0xff]  }
  0x19   : > { %603 = vmatprep.mubr.bf16.mxu1 %v1179_v12  ;;  %v1186_v24 = vld [vmem:[%s1285_s25 + $0x24] ss:$8 sps:$4 sm:$0xff]   ;;  %v1190_v26 = vld [vmem:[%s1285_s25 + $0x20] ss:$8 sps:$4 sm:$0xff]   ;;  %v1192_v28 = vld [vmem:[%s1285_s25 + $0x34] ss:$8 sps:$4 sm:$0xff]  }
  0x1a   : > { %v1188_v25 = vld [vmem:[%s1285_s25 + $0x64] ss:$8 sps:$4 sm:$0xff]   ;;  %v1191_v27 = vld [vmem:[%s1285_s25 + $0x60] ss:$8 sps:$4 sm:$0xff]   ;;  %v1194_v29 = vld [vmem:[%s1285_s25 + $0x74] ss:$8 sps:$4 sm:$0xff]  }
  0x1b   : > { %1059 = vmatpush3.bf16.msra.mxu0 %v1163_v5  ;;  %1128 = vmatpush3.bf16.msra.mxu1 %v1163_v5  ;;  %v1196_v30 = vld [vmem:[%s1285_s25 + $0x30] ss:$8 sps:$4 sm:$0xff]  }
  0x1c   : > { %1060 = vmatprep.subr.bf16.mxu0 %v1164_v6  ;;  %1121 = vmatprep.subr.bf16.mxu1 %v1164_v6  ;;  %v1197_v31 = vld [vmem:[%s1285_s25 + $0x70] ss:$8 sps:$4 sm:$0xff]  }
  0x1f   : > { %1061 = vmatpush3.bf16.msra.mxu0 %v1165_v7  ;;  %1129 = vmatpush3.bf16.msra.mxu1 %v1165_v7 }
  0x20   : > { %1062 = vmatprep.subr.bf16.mxu0 %v1166_v8  ;;  %1122 = vmatprep.subr.bf16.mxu1 %v1166_v8 }
  0x23   : > { %1063 = vmatpush3.bf16.msra.mxu0 %v1167_v9  ;;  %1130 = vmatpush3.bf16.msra.mxu1 %v1167_v9 }
  0x24   : > { %1064 = vmatprep.subr.bf16.mxu0 %v1168_v10  ;;  %1123 = vmatprep.subr.bf16.mxu1 %v1168_v10 }
  0x27   : > { %1065 = vmatpush3.bf16.msra.mxu0 %v1169_v13  ;;  %1131 = vmatpush3.bf16.msra.mxu1 %v1169_v13 }
  0x28   : > { %1066 = vmatprep.subr.bf16.mxu0 %v1170_v14  ;;  %1124 = vmatprep.subr.bf16.mxu1 %v1170_v14 }
  0x2b   : > { %1067 = vmatpush3.bf16.msra.mxu0 %v1171_v15  ;;  %1132 = vmatpush3.bf16.msra.mxu1 %v1171_v15 }
  0x2c   : > { %1068 = vmatprep.subr.bf16.mxu0 %v1172_v16  ;;  %1125 = vmatprep.subr.bf16.mxu1 %v1172_v16 }
  0x2f   : > { %1069 = vmatpush3.bf16.msra.mxu0 %v1173_v17  ;;  %1133 = vmatpush3.bf16.msra.mxu1 %v1173_v17 }
  0x32   : > { %572 = vmatmul.mubr.bf16.vlgmr.msra.gmra.mrb[0].mxu0 %v1174_v18  ;;  %604 = vmatmul.mubr.bf16.vlgmr.msra.gmra.mrb[0].mxu1 %v1177_v19 }
  0x33   : > { %579 = vmatprep.mubr.bf16.mxu0 %v1180_v20  ;;  %611 = vmatprep.mubr.bf16.mxu1 %v1182_v21 }
  0x3a   : > { %580 = vmatmul.mubr.bf16.gmra.mrb[4].mxu0 %v1184_v22  ;;  %612 = vmatmul.mubr.bf16.gmra.mrb[4].mxu1 %v1185_v23 }
  0x3b   : > { %587 = vmatprep.mubr.bf16.mxu0 %v1186_v24  ;;  %619 = vmatprep.mubr.bf16.mxu1 %v1188_v25 }
  0x42   : > { %588 = vmatmul.mubr.bf16.gmra.mrb[8].mxu0 %v1190_v26  ;;  %620 = vmatmul.mubr.bf16.gmra.mrb[8].mxu1 %v1191_v27 }
  0x43   : > { %595 = vmatprep.mubr.bf16.mxu0 %v1192_v28  ;;  %627 = vmatprep.mubr.bf16.mxu1 %v1194_v29 }
  0x4a   : > { %596 = vmatmul.mubr.bf16.gmra.mrb[12].mxu0 %v1196_v30  ;;  %628 = vmatmul.mubr.bf16.gmra.mrb[12].mxu1 %v1197_v31 }
 0x105   : > { %v1070_v32 = vpop.f32.mrb[0].mxu0  ;;  %v1094_v33 = vpop.f32.mrb[0].mxu1 }
 0x106   : > { %v1071_v34 = vpop.f32.mrb[1].mxu0  ;;  %v1095_v36 = vpop.f32.mrb[1].mxu1 }
 0x107   : > { %v1072_v37 = vadd.f32 %v1071_v34, %v1070_v32  ;;  %v1096_v38 = vadd.f32 %v1095_v36, %v1094_v33  ;;  %v1073_v39 = vpop.f32.mrb[2].mxu0  ;;  %v1097_v40 = vpop.f32.mrb[2].mxu1 }
 0x108   : > { %v1074_v42 = vpop.f32.mrb[3].mxu0  ;;  %v1098_v43 = vpop.f32.mrb[3].mxu1 }
 0x109   : > { %v643_v44 = vmul.f32 %v1072_v37, %v1313_v35  ;;  %v651_v45 = vmul.f32 %v1096_v38, %v1313_v35  ;;  %v1075_v46 = vadd.f32 %v1074_v42, %v1073_v39  ;;  %v1099_v47 = vadd.f32 %v1098_v43, %v1097_v40 }
 0x10b   : > { %v666_v48 = vadd.f32 %v1318_v41, %v643_v44  ;;  %v674_v49 = vadd.f32 %v1318_v41, %v651_v45  ;;  %v644_v50 = vmul.f32 %v1075_v46, %v1313_v35  ;;  %v652_v51 = vmul.f32 %v1099_v47, %v1313_v35 }
 0x10d   : > { %v667_v52 = vadd.f32 %v1318_v41, %v644_v50  ;;  %v675_v53 = vadd.f32 %v1318_v41, %v652_v51  ;;  %v1076_v54 = vpop.f32.mrb[4].mxu0  ;;  %v1100_v55 = vpop.f32.mrb[4].mxu1  ;;  %v682_v56 = vmax.f32 %v666_v48, 0.0  ;;  %v690_v57 = vmax.f32 %v674_v49, 0.0 }
 0x10e   : > { %v1077_v58 = vpop.f32.mrb[5].mxu0  ;;  %v1101_v59 = vpop.f32.mrb[5].mxu1 }
 0x10f   : > { %v683_v60 = vmax.f32 %v667_v52, 0.0  ;;  %v691_v61 = vmax.f32 %v675_v53, 0.0  ;;  %v1078_v62 = vadd.f32 %v1077_v58, %v1076_v54  ;;  %v1102_v63 = vadd.f32 %v1101_v59, %v1100_v55  ;;  %v1079_v0 = vpop.f32.mrb[6].mxu0  ;;  %v1103_v1 = vpop.f32.mrb[6].mxu1 }
 0x110   : > { %v1080_v2 = vpop.f32.mrb[7].mxu0  ;;  %v1104_v3 = vpop.f32.mrb[7].mxu1 }
 0x111   : > { %v1010_v4 = vpack.c.bf16 %v683_v60, %v682_v56  ;;  %v1030_v5 = vpack.c.bf16 %v691_v61, %v690_v57  ;;  %v645_v6 = vmul.f32 %v1078_v62, %v1313_v35  ;;  %v653_v7 = vmul.f32 %v1102_v63, %v1313_v35 }
 0x112   : > { %v1081_v8 = vadd.f32 %v1080_v2, %v1079_v0  ;;  %v1105_v9 = vadd.f32 %v1104_v3, %v1103_v1 }
 0x113   : > { %1011 = vst [vmem:[%s1332_s7] sm:$0xff] %v1010_v4   ;;  %1050 = vst [vmem:[%s1332_s7 + $0x20] sm:$0xff] %v1030_v5   ;;  %v668_v10 = vadd.f32 %v1318_v41, %v645_v6  ;;  %v676_v11 = vadd.f32 %v1318_v41, %v653_v7 }
 0x114   : > { %v646_v12 = vmul.f32 %v1081_v8, %v1313_v35  ;;  %v654_v13 = vmul.f32 %v1105_v9, %v1313_v35 }
 0x115   : > { %v1082_v14 = vpop.f32.mrb[8].mxu0  ;;  %v1106_v15 = vpop.f32.mrb[8].mxu1  ;;  %v684_v24 = vmax.f32 %v668_v10, 0.0  ;;  %v692_v25 = vmax.f32 %v676_v11, 0.0 }
 0x116   : > { %v669_v16 = vadd.f32 %v1318_v41, %v646_v12  ;;  %v677_v17 = vadd.f32 %v1318_v41, %v654_v13  ;;  %v1083_v18 = vpop.f32.mrb[9].mxu0  ;;  %v1107_v19 = vpop.f32.mrb[9].mxu1 }
 0x117   : > { %v1084_v20 = vadd.f32 %v1083_v18, %v1082_v14  ;;  %v1108_v21 = vadd.f32 %v1107_v19, %v1106_v15  ;;  %v1085_v22 = vpop.f32.mrb[10].mxu0  ;;  %v1109_v23 = vpop.f32.mrb[10].mxu1 }
 0x118   : > { %v685_v26 = vmax.f32 %v669_v16, 0.0  ;;  %v693_v27 = vmax.f32 %v677_v17, 0.0  ;;  %v1086_v28 = vpop.f32.mrb[11].mxu0  ;;  %v1110_v29 = vpop.f32.mrb[11].mxu1 }
 0x119   : > { %v647_v30 = vmul.f32 %v1084_v20, %v1313_v35  ;;  %v655_v31 = vmul.f32 %v1108_v21, %v1313_v35  ;;  %v1087_v32 = vadd.f32 %v1086_v28, %v1085_v22  ;;  %v1111_v33 = vadd.f32 %v1110_v29, %v1109_v23 }
 0x11a   : > { %v1015_v34 = vpack.c.bf16 %v685_v26, %v684_v24  ;;  %v1035_v36 = vpack.c.bf16 %v693_v27, %v692_v25 }
 0x11b   : > { %v670_v37 = vadd.f32 %v1318_v41, %v647_v30  ;;  %v678_v38 = vadd.f32 %v1318_v41, %v655_v31  ;;  %v648_v39 = vmul.f32 %v1087_v32, %v1313_v35  ;;  %v656_v40 = vmul.f32 %v1111_v33, %v1313_v35 }
 0x11c   : > { %1047 = vst [vmem:[%s1332_s7 + $0x8] sm:$0xff] %v1015_v34   ;;  %1051 = vst [vmem:[%s1332_s7 + $0x28] sm:$0xff] %v1035_v36  }
 0x11d   : > { %v671_v42 = vadd.f32 %v1318_v41, %v648_v39  ;;  %v679_v43 = vadd.f32 %v1318_v41, %v656_v40  ;;  %v1088_v44 = vpop.f32.mrb[12].mxu0  ;;  %v1112_v45 = vpop.f32.mrb[12].mxu1  ;;  %v686_v46 = vmax.f32 %v670_v37, 0.0  ;;  %v694_v47 = vmax.f32 %v678_v38, 0.0 }
 0x11e   : > { %v1089_v48 = vpop.f32.mrb[13].mxu0  ;;  %v1113_v49 = vpop.f32.mrb[13].mxu1 }
 0x11f   : > { %v687_v50 = vmax.f32 %v671_v42, 0.0  ;;  %v695_v51 = vmax.f32 %v679_v43, 0.0  ;;  %v1090_v52 = vadd.f32 %v1089_v48, %v1088_v44  ;;  %v1114_v53 = vadd.f32 %v1113_v49, %v1112_v45  ;;  %v1091_v54 = vpop.f32.mrb[14].mxu0  ;;  %v1115_v55 = vpop.f32.mrb[14].mxu1 }
 0x120   : > { %v1092_v56 = vpop.f32.mrb[15].mxu0  ;;  %v1116_v57 = vpop.f32.mrb[15].mxu1 }
 0x121   : > { %v1020_v58 = vpack.c.bf16 %v687_v50, %v686_v46  ;;  %v1040_v59 = vpack.c.bf16 %v695_v51, %v694_v47  ;;  %v649_v60 = vmul.f32 %v1090_v52, %v1313_v35  ;;  %v657_v61 = vmul.f32 %v1114_v53, %v1313_v35 }
 0x122   : > { %v1093_v62 = vadd.f32 %v1092_v56, %v1091_v54  ;;  %v1117_v63 = vadd.f32 %v1116_v57, %v1115_v55 }
 0x123   : > { %1048 = vst [vmem:[%s1332_s7 + $0x10] sm:$0xff] %v1020_v58   ;;  %1052 = vst [vmem:[%s1332_s7 + $0x30] sm:$0xff] %v1040_v59   ;;  %v672_v0 = vadd.f32 %v1318_v41, %v649_v60  ;;  %v680_v1 = vadd.f32 %v1318_v41, %v657_v61 }
 0x124   : > { %v650_v2 = vmul.f32 %v1093_v62, %v1313_v35  ;;  %v658_v3 = vmul.f32 %v1117_v63, %v1313_v35 }
 0x125   : > { %v688_v6 = vmax.f32 %v672_v0, 0.0  ;;  %v696_v7 = vmax.f32 %v680_v1, 0.0 }
 0x126   : > { %v673_v4 = vadd.f32 %v1318_v41, %v650_v2  ;;  %v681_v5 = vadd.f32 %v1318_v41, %v658_v3 }
 0x128   : > { %v689_v8 = vmax.f32 %v673_v4, 0.0  ;;  %v697_v9 = vmax.f32 %v681_v5, 0.0 }
 0x12a   : > { %v1025_v10 = vpack.c.bf16 %v689_v8, %v688_v6  ;;  %v1045_v11 = vpack.c.bf16 %v697_v9, %v696_v7 }
 0x12c   : > { %1049 = vst [vmem:[%s1332_s7 + $0x18] sm:$0xff] %v1025_v10   ;;  %1053 = vst [vmem:[%s1332_s7 + $0x38] sm:$0xff] %v1045_v11  }
 0x12d PF: > { %s14_s17 = sadd.s32 1, %s1220_s17   ;;  %s1380_s15 = smov %s1216_s16 }
 0x12e   : > { %p11_p5 = scmp.ge.s32.totalorder %s14_s17, 6   ;;  %s1381_s16 = smov %s1383_s18 }
 0x130   :  { %13 = sbr.rel (!%p11_p5) target bundleno = 2 (0x2), region = 75 }

// kernel: generator_forward.8
= control target key start
LH: loop header
LB: loop body
LE: loop exit
PB: predicated region body
PF: predicated region fallthrough
CT: control target
= control target key end

     0   :  { %s2217_s15 = smov 0   ;;  %s2219_s16 = smov 0   ;;  %s2477_s0 = inlined_call_operand.vmem [shape: bf16[4,512,128], index: 0, kind: input, shape index: {}]   ;;  %s2478_s1 = inlined_call_operand.vmem [shape: bf16[4,128,128], index: 1, kind: input, shape index: {}]   ;;  %s2479_s2 = inlined_call_operand.vmem [shape: f32[1,128], index: 2, kind: input, shape index: {}]   ;;  %s2480_s3 = inlined_call_operand.vmem [shape: f32[1,128], index: 3, kind: input, shape index: {}]   ;;  %s2481_s4 = inlined_call_operand.vmem [shape: bf16[4,512,128], index: 4, kind: output, shape index: {}]  }
   0x1   :  { %s2221_s17 = smov 0  }
   0x2 LB: > { %s33_s18 = sadd.s32 1, %s2186_s16  ;;  %p1595_p0 = scmp.ge.s32.totalorder %s2190_s17, 1  ;;  %s2190_s17 = sphi %s2221_s17, %s14_s17   ;;  %s2186_s16 = sphi %s2219_s16, %s2483_s16   ;;  %s2182_s15 = sphi %s2217_s15, %s2482_s15  }
   0x3   : > { %p35_p1 = scmp.ge.s32.totalorder %s33_s18, 4  ;;  %p223_p2 = scmp.lt.s32.totalorder %s2190_s17, 5 }
   0x5   : > { %s2485_s18 = smov (%p35_p1, %s33_s18), 0  ;;  %p224_p3 = pnand %p1595_p0, %p223_p2 }
   0x6   : > { %p275_p4 = scmp.lt.s32.totalorder (!%p224_p3), %s2182_s15, 3  ;;  %v2294_v40 = vld [vmem:[%s2479_s2] ss:$0 sm:$0xff] (!%p224_p3) }
   0x7   : > { %227 = sbr.rel (%p224_p3) target bundleno = 331 (0x14b), region = 36  ;;  %v2299_v42 = vld [vmem:[%s2480_s3] ss:$0 sm:$0xff] (!%p224_p3) }
   0xe   : > { %s2487_s15 = smov (!%p275_p4, %s2182_s15), 3 }
   0xf   : > { %s1711_s19 = sshll.u32 %s2487_s15, 6  ;;  %s1710_s23 = sshll.u32 %s2487_s15, 8 }
  0x10   : > { %s2241_s22 = scalar_lea.vmem %s2478_s1, %s1711_s19  ;;  %s2252_s26 = scalar_lea.vmem %s2477_s0, %s1710_s23 }
  0x11   : > { %v2128_v0 = vld [vmem:[%s2241_s22] sm:$0xff]   ;;  %v2129_v1 = vld [vmem:[%s2241_s22 + $0x8] sm:$0xff]   ;;  %v2130_v2 = vld [vmem:[%s2241_s22 + $0x10] sm:$0xff]   ;;  %s2322_s7 = scalar_lea.vmem %s2481_s4, %s1710_s23 }
  0x12   : > { %2008 = vmatprep.subr.bf16.mxu0 %v2128_v0  ;;  %2088 = vmatprep.subr.bf16.mxu1 %v2128_v0  ;;  %v2131_v3 = vld [vmem:[%s2241_s22 + $0x18] sm:$0xff]   ;;  %v2136_v4 = vld [vmem:[%s2252_s26] sm:$0xff]   ;;  %v2133_v7 = vld [vmem:[%s2241_s22 + $0x28] sm:$0xff]  }
  0x13   : > { %2009 = vmatpush3.bf16.msra.mxu0 %v2128_v0  ;;  %2096 = vmatpush3.bf16.msra.mxu1 %v2128_v0  ;;  %v2137_v5 = vld [vmem:[%s2252_s26 + $0x80] sm:$0xff]   ;;  %v2134_v8 = vld [vmem:[%s2241_s22 + $0x30] sm:$0xff]   ;;  %v2135_v9 = vld [vmem:[%s2241_s22 + $0x38] sm:$0xff]  }
  0x14   : > { %2010 = vmatprep.subr.bf16.mxu0 %v2129_v1  ;;  %2089 = vmatprep.subr.bf16.mxu1 %v2129_v1  ;;  %v2132_v6 = vld [vmem:[%s2241_s22 + $0x20] sm:$0xff]   ;;  %v2138_v10 = vld [vmem:[%s2252_s26 + $0x8] sm:$0xff]   ;;  %v2140_v12 = vld [vmem:[%s2252_s26 + $0x10] sm:$0xff]  }
  0x15   : > { %2024 = vmatprep.mubr.bf16.mxu0 %v2136_v4  ;;  %2056 = vmatprep.mubr.bf16.mxu1 %v2137_v5  ;;  %v2139_v11 = vld [vmem:[%s2252_s26 + $0x88] sm:$0xff]   ;;  %v2141_v13 = vld [vmem:[%s2252_s26 + $0x90] sm:$0xff]   ;;  %v2142_v14 = vld [vmem:[%s2252_s26 + $0x18] sm:$0xff]  }
  0x16   : > { %v2143_v15 = vld [vmem:[%s2252_s26 + $0x98] sm:$0xff]   ;;  %v2144_v16 = vld [vmem:[%s2252_s26 + $0x20] sm:$0xff]   ;;  %v2146_v18 = vld [vmem:[%s2252_s26 + $0x28] sm:$0xff]  }
  0x17   : > { %2011 = vmatpush3.bf16.msra.mxu0 %v2129_v1  ;;  %2097 = vmatpush3.bf16.msra.mxu1 %v2129_v1  ;;  %v2145_v17 = vld [vmem:[%s2252_s26 + $0xa0] sm:$0xff]   ;;  %v2147_v19 = vld [vmem:[%s2252_s26 + $0xa8] sm:$0xff]   ;;  %v2148_v20 = vld [vmem:[%s2252_s26 + $0x30] sm:$0xff]  }
  0x18   : > { %2012 = vmatprep.subr.bf16.mxu0 %v2130_v2  ;;  %2090 = vmatprep.subr.bf16.mxu1 %v2130_v2  ;;  %v2149_v21 = vld [vmem:[%s2252_s26 + $0xb0] sm:$0xff]   ;;  %v2150_v22 = vld [vmem:[%s2252_s26 + $0x38] sm:$0xff]   ;;  %v2152_v24 = vld [vmem:[%s2252_s26 + $0x40] sm:$0xff]  }
  0x19   : > { %v2151_v23 = vld [vmem:[%s2252_s26 + $0xb8] sm:$0xff]   ;;  %v2153_v25 = vld [vmem:[%s2252_s26 + $0xc0] sm:$0xff]   ;;  %v2154_v26 = vld [vmem:[%s2252_s26 + $0x48] sm:$0xff]  }
  0x1a   : > { %v2155_v27 = vld [vmem:[%s2252_s26 + $0xc8] sm:$0xff]   ;;  %v2156_v28 = vld [vmem:[%s2252_s26 + $0x50] sm:$0xff]   ;;  %v2158_v30 = vld [vmem:[%s2252_s26 + $0x58] sm:$0xff]  }
  0x1b   : > { %2013 = vmatpush3.bf16.msra.mxu0 %v2130_v2  ;;  %2098 = vmatpush3.bf16.msra.mxu1 %v2130_v2  ;;  %v2157_v29 = vld [vmem:[%s2252_s26 + $0xd0] sm:$0xff]   ;;  %v2159_v31 = vld [vmem:[%s2252_s26 + $0xd8] sm:$0xff]   ;;  %v2160_v32 = vld [vmem:[%s2252_s26 + $0x60] sm:$0xff]  }
  0x1c   : > { %2014 = vmatprep.subr.bf16.mxu0 %v2131_v3  ;;  %2091 = vmatprep.subr.bf16.mxu1 %v2131_v3  ;;  %v2161_v33 = vld [vmem:[%s2252_s26 + $0xe0] sm:$0xff]   ;;  %v2162_v34 = vld [vmem:[%s2252_s26 + $0x68] sm:$0xff]   ;;  %v2164_v36 = vld [vmem:[%s2252_s26 + $0x70] sm:$0xff]  }
  0x1d   : > { %v2163_v35 = vld [vmem:[%s2252_s26 + $0xe8] sm:$0xff]   ;;  %v2165_v37 = vld [vmem:[%s2252_s26 + $0xf0] sm:$0xff]   ;;  %v2166_v38 = vld [vmem:[%s2252_s26 + $0x78] sm:$0xff]  }
  0x1e   : > { %v2167_v39 = vld [vmem:[%s2252_s26 + $0xf8] sm:$0xff]  }
  0x1f   : > { %2015 = vmatpush3.bf16.msra.mxu0 %v2131_v3  ;;  %2099 = vmatpush3.bf16.msra.mxu1 %v2131_v3 }
  0x20   : > { %2016 = vmatprep.subr.bf16.mxu0 %v2132_v6  ;;  %2092 = vmatprep.subr.bf16.mxu1 %v2132_v6 }
  0x23   : > { %2017 = vmatpush3.bf16.msra.mxu0 %v2132_v6  ;;  %2100 = vmatpush3.bf16.msra.mxu1 %v2132_v6 }
  0x24   : > { %2018 = vmatprep.subr.bf16.mxu0 %v2133_v7  ;;  %2093 = vmatprep.subr.bf16.mxu1 %v2133_v7 }
  0x27   : > { %2019 = vmatpush3.bf16.msra.mxu0 %v2133_v7  ;;  %2101 = vmatpush3.bf16.msra.mxu1 %v2133_v7 }
  0x28   : > { %2020 = vmatprep.subr.bf16.mxu0 %v2134_v8  ;;  %2094 = vmatprep.subr.bf16.mxu1 %v2134_v8 }
  0x2b   : > { %2021 = vmatpush3.bf16.msra.mxu0 %v2134_v8  ;;  %2102 = vmatpush3.bf16.msra.mxu1 %v2134_v8 }
  0x2c   : > { %2022 = vmatprep.subr.bf16.mxu0 %v2135_v9  ;;  %2095 = vmatprep.subr.bf16.mxu1 %v2135_v9 }
  0x2f   : > { %2023 = vmatpush3.bf16.msra.mxu0 %v2135_v9  ;;  %2103 = vmatpush3.bf16.msra.mxu1 %v2135_v9 }
  0x32   : > { %2025 = vmatmul.mubr.bf16.vlgmr.msra.gmra.mrb[0].mxu0 %v2138_v10  ;;  %2057 = vmatmul.mubr.bf16.vlgmr.msra.gmra.mrb[0].mxu1 %v2139_v11 }
  0x33   : > { %2028 = vmatprep.mubr.bf16.mxu0 %v2140_v12  ;;  %2060 = vmatprep.mubr.bf16.mxu1 %v2141_v13 }
  0x3a   : > { %2029 = vmatmul.mubr.bf16.gmra.mrb[4].mxu0 %v2142_v14  ;;  %2061 = vmatmul.mubr.bf16.gmra.mrb[4].mxu1 %v2143_v15 }
  0x3b   : > { %2032 = vmatprep.mubr.bf16.mxu0 %v2144_v16  ;;  %2064 = vmatprep.mubr.bf16.mxu1 %v2145_v17 }
  0x42   : > { %2033 = vmatmul.mubr.bf16.gmra.mrb[8].mxu0 %v2146_v18  ;;  %2065 = vmatmul.mubr.bf16.gmra.mrb[8].mxu1 %v2147_v19 }
  0x43   : > { %2036 = vmatprep.mubr.bf16.mxu0 %v2148_v20  ;;  %2068 = vmatprep.mubr.bf16.mxu1 %v2149_v21 }
  0x4a   : > { %2037 = vmatmul.mubr.bf16.gmra.mrb[12].mxu0 %v2150_v22  ;;  %2069 = vmatmul.mubr.bf16.gmra.mrb[12].mxu1 %v2151_v23 }
  0x4b   : > { %2040 = vmatprep.mubr.bf16.mxu0 %v2152_v24  ;;  %2072 = vmatprep.mubr.bf16.mxu1 %v2153_v25 }
  0x52   : > { %2041 = vmatmul.mubr.bf16.gmra.mrb[16].mxu0 %v2154_v26  ;;  %2073 = vmatmul.mubr.bf16.gmra.mrb[16].mxu1 %v2155_v27 }
  0x53   : > { %2044 = vmatprep.mubr.bf16.mxu0 %v2156_v28  ;;  %2076 = vmatprep.mubr.bf16.mxu1 %v2157_v29 }
  0x5a   : > { %2045 = vmatmul.mubr.bf16.gmra.mrb[20].mxu0 %v2158_v30  ;;  %2077 = vmatmul.mubr.bf16.gmra.mrb[20].mxu1 %v2159_v31 }
  0x5b   : > { %2048 = vmatprep.mubr.bf16.mxu0 %v2160_v32  ;;  %2080 = vmatprep.mubr.bf16.mxu1 %v2161_v33 }
  0x62   : > { %2049 = vmatmul.mubr.bf16.gmra.mrb[24].mxu0 %v2162_v34  ;;  %2081 = vmatmul.mubr.bf16.gmra.mrb[24].mxu1 %v2163_v35 }
  0x63   : > { %2052 = vmatprep.mubr.bf16.mxu0 %v2164_v36  ;;  %2084 = vmatprep.mubr.bf16.mxu1 %v2165_v37 }
  0x6a   : > { %2053 = vmatmul.mubr.bf16.gmra.mrb[28].mxu0 %v2166_v38  ;;  %2085 = vmatmul.mubr.bf16.gmra.mrb[28].mxu1 %v2167_v39 }
 0x105   : > { %v2026_v41 = vpop.f32.mrb[0].mxu0  ;;  %v2058_v43 = vpop.f32.mrb[0].mxu1 }
 0x106   : > { %v930_v44 = vmul.f32 %v2026_v41, %v2294_v40  ;;  %v962_v45 = vmul.f32 %v2058_v43, %v2294_v40  ;;  %v666_v46 = vpop.f32.mrb[1].mxu0  ;;  %v794_v47 = vpop.f32.mrb[1].mxu1 }
 0x107   : > { %v928_v48 = vmul.f32 %v2294_v40, %v666_v46  ;;  %v960_v49 = vmul.f32 %v2294_v40, %v794_v47  ;;  %v2027_v50 = vpop.f32.mrb[2].mxu0  ;;  %v2059_v51 = vpop.f32.mrb[2].mxu1 }
 0x108   : > { %v1001_v52 = vadd.f32 %v2299_v42, %v930_v44  ;;  %v1033_v53 = vadd.f32 %v2299_v42, %v962_v45  ;;  %v931_v54 = vmul.f32 %v2027_v50, %v2294_v40  ;;  %v963_v55 = vmul.f32 %v2059_v51, %v2294_v40  ;;  %v669_v56 = vpop.f32.mrb[3].mxu0  ;;  %v797_v57 = vpop.f32.mrb[3].mxu1 }
 0x109   : > { %v999_v58 = vadd.f32 %v2299_v42, %v928_v48  ;;  %v1031_v59 = vadd.f32 %v2299_v42, %v960_v49  ;;  %v929_v60 = vmul.f32 %v2294_v40, %v669_v56  ;;  %v961_v61 = vmul.f32 %v2294_v40, %v797_v57 }
 0x10a   : > { %v1002_v62 = vadd.f32 %v2299_v42, %v931_v54  ;;  %v1034_v63 = vadd.f32 %v2299_v42, %v963_v55  ;;  %v1065_v2 = vmax.f32 %v1001_v52, 0.0  ;;  %v1097_v3 = vmax.f32 %v1033_v53, 0.0 }
 0x10b   : > { %v1000_v0 = vadd.f32 %v2299_v42, %v929_v60  ;;  %v1032_v1 = vadd.f32 %v2299_v42, %v961_v61  ;;  %v1063_v6 = vmax.f32 %v999_v58, 0.0  ;;  %v1095_v7 = vmax.f32 %v1031_v59, 0.0 }
 0x10c   : > { %v1066_v4 = vmax.f32 %v1002_v62, 0.0  ;;  %v1098_v5 = vmax.f32 %v1034_v63, 0.0 }
 0x10d   : > { %v1064_v8 = vmax.f32 %v1000_v0, 0.0  ;;  %v1096_v9 = vmax.f32 %v1032_v1, 0.0  ;;  %v2030_v10 = vpop.f32.mrb[4].mxu0  ;;  %v2062_v11 = vpop.f32.mrb[4].mxu1 }
 0x10e   : > { %v1785_v12 = vpack.c.bf16 %v1066_v4, %v1065_v2  ;;  %v1865_v13 = vpack.c.bf16 %v1098_v5, %v1097_v3  ;;  %v934_v14 = vmul.f32 %v2030_v10, %v2294_v40  ;;  %v966_v15 = vmul.f32 %v2062_v11, %v2294_v40  ;;  %v682_v16 = vpop.f32.mrb[5].mxu0  ;;  %v810_v17 = vpop.f32.mrb[5].mxu1 }
 0x10f   : > { %v1780_v18 = vpack.c.bf16 %v1064_v8, %v1063_v6  ;;  %v1860_v19 = vpack.c.bf16 %v1096_v9, %v1095_v7  ;;  %v932_v20 = vmul.f32 %v2294_v40, %v682_v16  ;;  %v964_v21 = vmul.f32 %v2294_v40, %v810_v17  ;;  %v2031_v22 = vpop.f32.mrb[6].mxu0  ;;  %v2063_v23 = vpop.f32.mrb[6].mxu1 }
 0x110   : > { %1937 = vst [vmem:[%s2322_s7 + $0x8] sm:$0xff] %v1785_v12   ;;  %1953 = vst [vmem:[%s2322_s7 + $0x88] sm:$0xff] %v1865_v13   ;;  %v1005_v24 = vadd.f32 %v2299_v42, %v934_v14  ;;  %v1037_v25 = vadd.f32 %v2299_v42, %v966_v15  ;;  %v935_v26 = vmul.f32 %v2031_v22, %v2294_v40  ;;  %v685_v28 = vpop.f32.mrb[7].mxu0  ;;  %v813_v29 = vpop.f32.mrb[7].mxu1 }
 0x111   : > { %v967_v27 = vmul.f32 %v2063_v23, %v2294_v40  ;;  %1781 = vst [vmem:[%s2322_s7] sm:$0xff] %v1780_v18   ;;  %1952 = vst [vmem:[%s2322_s7 + $0x80] sm:$0xff] %v1860_v19   ;;  %v1003_v30 = vadd.f32 %v2299_v42, %v932_v20  ;;  %v1035_v31 = vadd.f32 %v2299_v42, %v964_v21 }
 0x112   : > { %v933_v32 = vmul.f32 %v2294_v40, %v685_v28  ;;  %v965_v33 = vmul.f32 %v2294_v40, %v813_v29  ;;  %v1006_v34 = vadd.f32 %v2299_v42, %v935_v26  ;;  %v1069_v38 = vmax.f32 %v1005_v24, 0.0 }
 0x113   : > { %v1038_v35 = vadd.f32 %v2299_v42, %v967_v27  ;;  %v1101_v39 = vmax.f32 %v1037_v25, 0.0  ;;  %v1067_v44 = vmax.f32 %v1003_v30, 0.0  ;;  %v1099_v45 = vmax.f32 %v1035_v31, 0.0 }
 0x114   : > { %v1004_v36 = vadd.f32 %v2299_v42, %v933_v32  ;;  %v1036_v37 = vadd.f32 %v2299_v42, %v965_v33  ;;  %v1070_v41 = vmax.f32 %v1006_v34, 0.0 }
 0x115   : > { %v1102_v43 = vmax.f32 %v1038_v35, 0.0  ;;  %v2034_v48 = vpop.f32.mrb[8].mxu0  ;;  %v2066_v49 = vpop.f32.mrb[8].mxu1 }
 0x116   : > { %v1068_v46 = vmax.f32 %v1004_v36, 0.0  ;;  %v1100_v47 = vmax.f32 %v1036_v37, 0.0  ;;  %v1795_v50 = vpack.c.bf16 %v1070_v41, %v1069_v38  ;;  %v938_v52 = vmul.f32 %v2034_v48, %v2294_v40  ;;  %v698_v54 = vpop.f32.mrb[9].mxu0  ;;  %v826_v55 = vpop.f32.mrb[9].mxu1 }
 0x117   : > { %v1875_v51 = vpack.c.bf16 %v1102_v43, %v1101_v39  ;;  %v970_v53 = vmul.f32 %v2066_v49, %v2294_v40  ;;  %v936_v58 = vmul.f32 %v2294_v40, %v698_v54  ;;  %v968_v59 = vmul.f32 %v2294_v40, %v826_v55  ;;  %v2035_v60 = vpop.f32.mrb[10].mxu0  ;;  %v2067_v61 = vpop.f32.mrb[10].mxu1 }
 0x118   : > { %v1790_v56 = vpack.c.bf16 %v1068_v46, %v1067_v44  ;;  %v1870_v57 = vpack.c.bf16 %v1100_v47, %v1099_v45  ;;  %1939 = vst [vmem:[%s2322_s7 + $0x18] sm:$0xff] %v1795_v50   ;;  %v1009_v62 = vadd.f32 %v2299_v42, %v938_v52  ;;  %v939_v0 = vmul.f32 %v2035_v60, %v2294_v40  ;;  %v701_v2 = vpop.f32.mrb[11].mxu0  ;;  %v829_v3 = vpop.f32.mrb[11].mxu1 }
 0x119   : > { %1955 = vst [vmem:[%s2322_s7 + $0x98] sm:$0xff] %v1875_v51   ;;  %v1041_v63 = vadd.f32 %v2299_v42, %v970_v53  ;;  %v971_v1 = vmul.f32 %v2067_v61, %v2294_v40  ;;  %v1007_v4 = vadd.f32 %v2299_v42, %v936_v58  ;;  %v1039_v5 = vadd.f32 %v2299_v42, %v968_v59 }
 0x11a   : > { %1938 = vst [vmem:[%s2322_s7 + $0x10] sm:$0xff] %v1790_v56   ;;  %1954 = vst [vmem:[%s2322_s7 + $0x90] sm:$0xff] %v1870_v57   ;;  %v937_v6 = vmul.f32 %v2294_v40, %v701_v2  ;;  %v969_v7 = vmul.f32 %v2294_v40, %v829_v3  ;;  %v1010_v8 = vadd.f32 %v2299_v42, %v939_v0  ;;  %v1073_v12 = vmax.f32 %v1009_v62, 0.0 }
 0x11b   : > { %v1042_v9 = vadd.f32 %v2299_v42, %v971_v1  ;;  %v1105_v13 = vmax.f32 %v1041_v63, 0.0  ;;  %v1071_v16 = vmax.f32 %v1007_v4, 0.0  ;;  %v1103_v17 = vmax.f32 %v1039_v5, 0.0 }
 0x11c   : > { %v1008_v10 = vadd.f32 %v2299_v42, %v937_v6  ;;  %v1040_v11 = vadd.f32 %v2299_v42, %v969_v7  ;;  %v1074_v14 = vmax.f32 %v1010_v8, 0.0 }
 0x11d   : > { %v1106_v15 = vmax.f32 %v1042_v9, 0.0  ;;  %v2038_v20 = vpop.f32.mrb[12].mxu0  ;;  %v2070_v21 = vpop.f32.mrb[12].mxu1 }
 0x11e   : > { %v1072_v18 = vmax.f32 %v1008_v10, 0.0  ;;  %v1104_v19 = vmax.f32 %v1040_v11, 0.0  ;;  %v1805_v22 = vpack.c.bf16 %v1074_v14, %v1073_v12  ;;  %v942_v24 = vmul.f32 %v2038_v20, %v2294_v40  ;;  %v714_v26 = vpop.f32.mrb[13].mxu0  ;;  %v842_v27 = vpop.f32.mrb[13].mxu1 }
 0x11f   : > { %v1885_v23 = vpack.c.bf16 %v1106_v15, %v1105_v13  ;;  %v974_v25 = vmul.f32 %v2070_v21, %v2294_v40  ;;  %v940_v30 = vmul.f32 %v2294_v40, %v714_v26  ;;  %v972_v31 = vmul.f32 %v2294_v40, %v842_v27  ;;  %v2039_v32 = vpop.f32.mrb[14].mxu0  ;;  %v2071_v33 = vpop.f32.mrb[14].mxu1 }
 0x120   : > { %v1800_v28 = vpack.c.bf16 %v1072_v18, %v1071_v16  ;;  %v1880_v29 = vpack.c.bf16 %v1104_v19, %v1103_v17  ;;  %1941 = vst [vmem:[%s2322_s7 + $0x28] sm:$0xff] %v1805_v22   ;;  %v1013_v34 = vadd.f32 %v2299_v42, %v942_v24  ;;  %v943_v36 = vmul.f32 %v2039_v32, %v2294_v40  ;;  %v717_v38 = vpop.f32.mrb[15].mxu0  ;;  %v845_v39 = vpop.f32.mrb[15].mxu1 }
 0x121   : > { %1957 = vst [vmem:[%s2322_s7 + $0xa8] sm:$0xff] %v1885_v23   ;;  %v1045_v35 = vadd.f32 %v2299_v42, %v974_v25  ;;  %v975_v37 = vmul.f32 %v2071_v33, %v2294_v40  ;;  %v1011_v41 = vadd.f32 %v2299_v42, %v940_v30  ;;  %v1043_v43 = vadd.f32 %v2299_v42, %v972_v31 }
 0x122   : > { %1940 = vst [vmem:[%s2322_s7 + $0x20] sm:$0xff] %v1800_v28   ;;  %1956 = vst [vmem:[%s2322_s7 + $0xa0] sm:$0xff] %v1880_v29   ;;  %v941_v44 = vmul.f32 %v2294_v40, %v717_v38  ;;  %v973_v45 = vmul.f32 %v2294_v40, %v845_v39  ;;  %v1014_v46 = vadd.f32 %v2299_v42, %v943_v36  ;;  %v1077_v50 = vmax.f32 %v1013_v34, 0.0 }
 0x123   : > { %v1046_v47 = vadd.f32 %v2299_v42, %v975_v37  ;;  %v1109_v51 = vmax.f32 %v1045_v35, 0.0  ;;  %v1075_v54 = vmax.f32 %v1011_v41, 0.0  ;;  %v1107_v55 = vmax.f32 %v1043_v43, 0.0 }
 0x124   : > { %v1012_v48 = vadd.f32 %v2299_v42, %v941_v44  ;;  %v1044_v49 = vadd.f32 %v2299_v42, %v973_v45  ;;  %v1078_v52 = vmax.f32 %v1014_v46, 0.0 }
 0x125   : > { %v1110_v53 = vmax.f32 %v1046_v47, 0.0  ;;  %v2042_v58 = vpop.f32.mrb[16].mxu0  ;;  %v2074_v59 = vpop.f32.mrb[16].mxu1 }
 0x126   : > { %v1076_v56 = vmax.f32 %v1012_v48, 0.0  ;;  %v1108_v57 = vmax.f32 %v1044_v49, 0.0  ;;  %v1815_v60 = vpack.c.bf16 %v1078_v52, %v1077_v50  ;;  %v946_v62 = vmul.f32 %v2042_v58, %v2294_v40  ;;  %v730_v0 = vpop.f32.mrb[17].mxu0  ;;  %v858_v1 = vpop.f32.mrb[17].mxu1 }
 0x127   : > { %v1895_v61 = vpack.c.bf16 %v1110_v53, %v1109_v51  ;;  %v978_v63 = vmul.f32 %v2074_v59, %v2294_v40  ;;  %v944_v4 = vmul.f32 %v2294_v40, %v730_v0  ;;  %v976_v5 = vmul.f32 %v2294_v40, %v858_v1  ;;  %v2043_v6 = vpop.f32.mrb[18].mxu0  ;;  %v2075_v7 = vpop.f32.mrb[18].mxu1 }
 0x128   : > { %v1810_v2 = vpack.c.bf16 %v1076_v56, %v1075_v54  ;;  %v1890_v3 = vpack.c.bf16 %v1108_v57, %v1107_v55  ;;  %1943 = vst [vmem:[%s2322_s7 + $0x38] sm:$0xff] %v1815_v60   ;;  %v1017_v8 = vadd.f32 %v2299_v42, %v946_v62  ;;  %v947_v10 = vmul.f32 %v2043_v6, %v2294_v40  ;;  %v733_v12 = vpop.f32.mrb[19].mxu0  ;;  %v861_v13 = vpop.f32.mrb[19].mxu1 }
 0x129   : > { %1959 = vst [vmem:[%s2322_s7 + $0xb8] sm:$0xff] %v1895_v61   ;;  %v1049_v9 = vadd.f32 %v2299_v42, %v978_v63  ;;  %v979_v11 = vmul.f32 %v2075_v7, %v2294_v40  ;;  %v1015_v14 = vadd.f32 %v2299_v42, %v944_v4  ;;  %v1047_v15 = vadd.f32 %v2299_v42, %v976_v5 }
 0x12a   : > { %1942 = vst [vmem:[%s2322_s7 + $0x30] sm:$0xff] %v1810_v2   ;;  %1958 = vst [vmem:[%s2322_s7 + $0xb0] sm:$0xff] %v1890_v3   ;;  %v945_v16 = vmul.f32 %v2294_v40, %v733_v12  ;;  %v977_v17 = vmul.f32 %v2294_v40, %v861_v13  ;;  %v1018_v18 = vadd.f32 %v2299_v42, %v947_v10  ;;  %v1081_v22 = vmax.f32 %v1017_v8, 0.0 }
 0x12b   : > { %v1050_v19 = vadd.f32 %v2299_v42, %v979_v11  ;;  %v1113_v23 = vmax.f32 %v1049_v9, 0.0  ;;  %v1079_v26 = vmax.f32 %v1015_v14, 0.0  ;;  %v1111_v27 = vmax.f32 %v1047_v15, 0.0 }
 0x12c   : > { %v1016_v20 = vadd.f32 %v2299_v42, %v945_v16  ;;  %v1048_v21 = vadd.f32 %v2299_v42, %v977_v17  ;;  %v1082_v24 = vmax.f32 %v1018_v18, 0.0 }
 0x12d   : > { %v1114_v25 = vmax.f32 %v1050_v19, 0.0  ;;  %v2046_v30 = vpop.f32.mrb[20].mxu0  ;;  %v2078_v31 = vpop.f32.mrb[20].mxu1 }
 0x12e   : > { %v1080_v28 = vmax.f32 %v1016_v20, 0.0  ;;  %v1112_v29 = vmax.f32 %v1048_v21, 0.0  ;;  %v1825_v32 = vpack.c.bf16 %v1082_v24, %v1081_v22  ;;  %v950_v34 = vmul.f32 %v2046_v30, %v2294_v40  ;;  %v746_v36 = vpop.f32.mrb[21].mxu0  ;;  %v874_v37 = vpop.f32.mrb[21].mxu1 }
 0x12f   : > { %v1905_v33 = vpack.c.bf16 %v1114_v25, %v1113_v23  ;;  %v982_v35 = vmul.f32 %v2078_v31, %v2294_v40  ;;  %v948_v41 = vmul.f32 %v2294_v40, %v746_v36  ;;  %v980_v43 = vmul.f32 %v2294_v40, %v874_v37  ;;  %v2047_v44 = vpop.f32.mrb[22].mxu0  ;;  %v2079_v45 = vpop.f32.mrb[22].mxu1 }
 0x130   : > { %v1820_v38 = vpack.c.bf16 %v1080_v28, %v1079_v26  ;;  %v1900_v39 = vpack.c.bf16 %v1112_v29, %v1111_v27  ;;  %1945 = vst [vmem:[%s2322_s7 + $0x48] sm:$0xff] %v1825_v32   ;;  %v1021_v46 = vadd.f32 %v2299_v42, %v950_v34  ;;  %v951_v48 = vmul.f32 %v2047_v44, %v2294_v40  ;;  %v749_v50 = vpop.f32.mrb[23].mxu0  ;;  %v877_v51 = vpop.f32.mrb[23].mxu1 }
 0x131   : > { %1961 = vst [vmem:[%s2322_s7 + $0xc8] sm:$0xff] %v1905_v33   ;;  %v1053_v47 = vadd.f32 %v2299_v42, %v982_v35  ;;  %v983_v49 = vmul.f32 %v2079_v45, %v2294_v40  ;;  %v1019_v52 = vadd.f32 %v2299_v42, %v948_v41  ;;  %v1051_v53 = vadd.f32 %v2299_v42, %v980_v43 }
 0x132   : > { %1944 = vst [vmem:[%s2322_s7 + $0x40] sm:$0xff] %v1820_v38   ;;  %1960 = vst [vmem:[%s2322_s7 + $0xc0] sm:$0xff] %v1900_v39   ;;  %v949_v54 = vmul.f32 %v2294_v40, %v749_v50  ;;  %v981_v55 = vmul.f32 %v2294_v40, %v877_v51  ;;  %v1022_v56 = vadd.f32 %v2299_v42, %v951_v48  ;;  %v1085_v60 = vmax.f32 %v1021_v46, 0.0 }
 0x133   : > { %v1054_v57 = vadd.f32 %v2299_v42, %v983_v49  ;;  %v1117_v61 = vmax.f32 %v1053_v47, 0.0  ;;  %v1083_v0 = vmax.f32 %v1019_v52, 0.0  ;;  %v1115_v1 = vmax.f32 %v1051_v53, 0.0 }
 0x134   : > { %v1020_v58 = vadd.f32 %v2299_v42, %v949_v54  ;;  %v1052_v59 = vadd.f32 %v2299_v42, %v981_v55  ;;  %v1086_v62 = vmax.f32 %v1022_v56, 0.0 }
 0x135   : > { %v1118_v63 = vmax.f32 %v1054_v57, 0.0  ;;  %v2050_v4 = vpop.f32.mrb[24].mxu0  ;;  %v2082_v5 = vpop.f32.mrb[24].mxu1 }
 0x136   : > { %v1084_v2 = vmax.f32 %v1020_v58, 0.0  ;;  %v1116_v3 = vmax.f32 %v1052_v59, 0.0  ;;  %v1835_v6 = vpack.c.bf16 %v1086_v62, %v1085_v60  ;;  %v954_v8 = vmul.f32 %v2050_v4, %v2294_v40  ;;  %v762_v10 = vpop.f32.mrb[25].mxu0  ;;  %v890_v11 = vpop.f32.mrb[25].mxu1 }
 0x137   : > { %v1915_v7 = vpack.c.bf16 %v1118_v63, %v1117_v61  ;;  %v986_v9 = vmul.f32 %v2082_v5, %v2294_v40  ;;  %v952_v14 = vmul.f32 %v2294_v40, %v762_v10  ;;  %v984_v15 = vmul.f32 %v2294_v40, %v890_v11  ;;  %v2051_v16 = vpop.f32.mrb[26].mxu0  ;;  %v2083_v17 = vpop.f32.mrb[26].mxu1 }
 0x138   : > { %v1830_v12 = vpack.c.bf16 %v1084_v2, %v1083_v0  ;;  %v1910_v13 = vpack.c.bf16 %v1116_v3, %v1115_v1  ;;  %1947 = vst [vmem:[%s2322_s7 + $0x58] sm:$0xff] %v1835_v6   ;;  %v1025_v18 = vadd.f32 %v2299_v42, %v954_v8  ;;  %v955_v20 = vmul.f32 %v2051_v16, %v2294_v40  ;;  %v765_v22 = vpop.f32.mrb[27].mxu0  ;;  %v893_v23 = vpop.f32.mrb[27].mxu1 }
 0x139   : > { %1963 = vst [vmem:[%s2322_s7 + $0xd8] sm:$0xff] %v1915_v7   ;;  %v1057_v19 = vadd.f32 %v2299_v42, %v986_v9  ;;  %v987_v21 = vmul.f32 %v2083_v17, %v2294_v40  ;;  %v1023_v24 = vadd.f32 %v2299_v42, %v952_v14  ;;  %v1055_v25 = vadd.f32 %v2299_v42, %v984_v15 }
 0x13a   : > { %1946 = vst [vmem:[%s2322_s7 + $0x50] sm:$0xff] %v1830_v12   ;;  %1962 = vst [vmem:[%s2322_s7 + $0xd0] sm:$0xff] %v1910_v13   ;;  %v953_v26 = vmul.f32 %v2294_v40, %v765_v22  ;;  %v985_v27 = vmul.f32 %v2294_v40, %v893_v23  ;;  %v1026_v28 = vadd.f32 %v2299_v42, %v955_v20  ;;  %v1089_v32 = vmax.f32 %v1025_v18, 0.0 }
 0x13b   : > { %v1058_v29 = vadd.f32 %v2299_v42, %v987_v21  ;;  %v1121_v33 = vmax.f32 %v1057_v19, 0.0  ;;  %v1087_v36 = vmax.f32 %v1023_v24, 0.0  ;;  %v1119_v37 = vmax.f32 %v1055_v25, 0.0 }
 0x13c   : > { %v1024_v30 = vadd.f32 %v2299_v42, %v953_v26  ;;  %v1056_v31 = vadd.f32 %v2299_v42, %v985_v27  ;;  %v1090_v34 = vmax.f32 %v1026_v28, 0.0 }
 0x13d   : > { %v1122_v35 = vmax.f32 %v1058_v29, 0.0  ;;  %v2054_v41 = vpop.f32.mrb[28].mxu0  ;;  %v2086_v43 = vpop.f32.mrb[28].mxu1 }
 0x13e   : > { %v1088_v38 = vmax.f32 %v1024_v30, 0.0  ;;  %v1120_v39 = vmax.f32 %v1056_v31, 0.0  ;;  %v1845_v44 = vpack.c.bf16 %v1090_v34, %v1089_v32  ;;  %v958_v46 = vmul.f32 %v2054_v41, %v2294_v40  ;;  %v778_v48 = vpop.f32.mrb[29].mxu0  ;;  %v906_v49 = vpop.f32.mrb[29].mxu1 }
 0x13f   : > { %v1925_v45 = vpack.c.bf16 %v1122_v35, %v1121_v33  ;;  %v990_v47 = vmul.f32 %v2086_v43, %v2294_v40  ;;  %v956_v52 = vmul.f32 %v2294_v40, %v778_v48  ;;  %v988_v53 = vmul.f32 %v2294_v40, %v906_v49  ;;  %v2055_v54 = vpop.f32.mrb[30].mxu0  ;;  %v2087_v55 = vpop.f32.mrb[30].mxu1 }
 0x140   : > { %v1840_v50 = vpack.c.bf16 %v1088_v38, %v1087_v36  ;;  %v1920_v51 = vpack.c.bf16 %v1120_v39, %v1119_v37  ;;  %1949 = vst [vmem:[%s2322_s7 + $0x68] sm:$0xff] %v1845_v44   ;;  %v1029_v56 = vadd.f32 %v2299_v42, %v958_v46  ;;  %v959_v58 = vmul.f32 %v2055_v54, %v2294_v40  ;;  %v781_v60 = vpop.f32.mrb[31].mxu0  ;;  %v909_v61 = vpop.f32.mrb[31].mxu1 }
 0x141   : > { %1965 = vst [vmem:[%s2322_s7 + $0xe8] sm:$0xff] %v1925_v45   ;;  %v1061_v57 = vadd.f32 %v2299_v42, %v990_v47  ;;  %v991_v59 = vmul.f32 %v2087_v55, %v2294_v40  ;;  %v1027_v62 = vadd.f32 %v2299_v42, %v956_v52  ;;  %v1059_v63 = vadd.f32 %v2299_v42, %v988_v53 }
 0x142   : > { %1948 = vst [vmem:[%s2322_s7 + $0x60] sm:$0xff] %v1840_v50   ;;  %1964 = vst [vmem:[%s2322_s7 + $0xe0] sm:$0xff] %v1920_v51   ;;  %v957_v0 = vmul.f32 %v2294_v40, %v781_v60  ;;  %v989_v1 = vmul.f32 %v2294_v40, %v909_v61  ;;  %v1030_v2 = vadd.f32 %v2299_v42, %v959_v58  ;;  %v1093_v6 = vmax.f32 %v1029_v56, 0.0 }
 0x143   : > { %v1062_v3 = vadd.f32 %v2299_v42, %v991_v59  ;;  %v1125_v7 = vmax.f32 %v1061_v57, 0.0  ;;  %v1091_v10 = vmax.f32 %v1027_v62, 0.0  ;;  %v1123_v11 = vmax.f32 %v1059_v63, 0.0 }
 0x144   : > { %v1028_v4 = vadd.f32 %v2299_v42, %v957_v0  ;;  %v1060_v5 = vadd.f32 %v2299_v42, %v989_v1  ;;  %v1094_v8 = vmax.f32 %v1030_v2, 0.0 }
 0x145   : > { %v1126_v9 = vmax.f32 %v1062_v3, 0.0 }
 0x146   : > { %v1092_v12 = vmax.f32 %v1028_v4, 0.0  ;;  %v1124_v40 = vmax.f32 %v1060_v5, 0.0  ;;  %v1855_v13 = vpack.c.bf16 %v1094_v8, %v1093_v6 }
 0x147   : > { %v1935_v14 = vpack.c.bf16 %v1126_v9, %v1125_v7 }
 0x148   : > { %v1850_v15 = vpack.c.bf16 %v1092_v12, %v1091_v10  ;;  %v1930_v16 = vpack.c.bf16 %v1124_v40, %v1123_v11  ;;  %1951 = vst [vmem:[%s2322_s7 + $0x78] sm:$0xff] %v1855_v13  }
 0x149   : > { %1967 = vst [vmem:[%s2322_s7 + $0xf8] sm:$0xff] %v1935_v14  }
 0x14a   : > { %1950 = vst [vmem:[%s2322_s7 + $0x70] sm:$0xff] %v1850_v15   ;;  %1966 = vst [vmem:[%s2322_s7 + $0xf0] sm:$0xff] %v1930_v16  }
 0x14b PF: > { %s14_s17 = sadd.s32 1, %s2190_s17   ;;  %s2482_s15 = smov %s2186_s16 }
 0x14c   : > { %p11_p5 = scmp.ge.s32.totalorder %s14_s17, 6   ;;  %s2483_s16 = smov %s2485_s18 }
 0x14e   :  { %13 = sbr.rel (!%p11_p5) target bundleno = 2 (0x2), region = 75 }

// kernel: generator_forward.9
= control target key start
LH: loop header
LB: loop body
LE: loop exit
PB: predicated region body
PF: predicated region fallthrough
CT: control target
= control target key end

     0   :  { %s1805_s15 = smov 0   ;;  %s1807_s16 = smov 0   ;;  %s2111_s0 = inlined_call_operand.vmem [shape: bf16[4,2048,128], index: 0, kind: input, shape index: {}]   ;;  %s2112_s1 = inlined_call_operand.vmem [shape: bf16[4,128,128], index: 1, kind: input, shape index: {}]   ;;  %s2113_s2 = inlined_call_operand.vmem [shape: f32[1,128], index: 2, kind: input, shape index: {}]   ;;  %s2114_s3 = inlined_call_operand.vmem [shape: f32[1,128], index: 3, kind: input, shape index: {}]   ;;  %s2115_s4 = inlined_call_operand.vmem [shape: f32[4,2048,128], index: 4, kind: output, shape index: {}]  }
   0x1   :  { %s1809_s17 = smov 0   ;;  %s1811_s18 = smov 0  }
   0x2   :  { %s1813_s19 = smov 0  }
   0x3 LB: > { %s29_s20 = sadd.s32 1, %s1770_s17  ;;  %s33_s21 = sadd.s32 1, %s1774_s18  ;;  %s1778_s19 = sphi %s1813_s19, %s14_s19   ;;  %s1774_s18 = sphi %s1811_s18, %s2119_s18   ;;  %s1770_s17 = sphi %s1809_s17, %s2118_s17   ;;  %s1766_s16 = sphi %s1807_s16, %s2117_s16   ;;  %s1762_s15 = sphi %s1805_s15, %s2116_s15  }
   0x4   : > { %p31_p0 = scmp.ge.s32.totalorder %s29_s20, 4  ;;  %p1342_p1 = scmp.ge.s32.totalorder %s1778_s19, 1 }
   0x5   : > { %p223_p2 = scmp.lt.s32.totalorder %s1778_s19, 17 }
   0x6   : > { %s2121_s20 = smov (%p31_p0, %s29_s20), 0  ;;  %s2123_s21 = smov (!%p31_p0, %s33_s21), %s1774_s18 }
   0x7   : > { %p224_p3 = pnand %p1342_p1, %p223_p2  ;;  %p35_p4 = scmp.ge.s32.totalorder %s2123_s21, 4 }
   0x8   : > { %s1343_s22 = sshll.u32 (!%p224_p3), %s1762_s15, 6  ;;  %p275_p5 = scmp.lt.s32.totalorder (!%p224_p3), %s1766_s16, 3  ;;  %v1891_v40 = vld [vmem:[%s2113_s2] ss:$0 sm:$0xff] (!%p224_p3) }
   0x9   : > { %s2125_s21 = smov (%p35_p4, %s2123_s21), 0  ;;  %227 = sbr.rel (%p224_p3) target bundleno = 346 (0x15a), region = 36 }
   0xa   : > { %p277_p6 = scmp.lt.s32.totalorder (!%p224_p3), %s1343_s22, 255  ;;  %v1896_v42 = vld [vmem:[%s2114_s3] ss:$0 sm:$0xff] (!%p224_p3) }
  0x10   : > { %s2127_s16 = smov (!%p275_p5, %s1766_s16), 3  ;;  %s2129_s22 = smov (!%p277_p6, %s1343_s22), 255 }
  0x11   : > { %s1344_s23 = sshll.u32 %s2127_s16, 8  ;;  %s1395_s24 = sshll.u32 %s2127_s16, 6 }
  0x12   : > { %s1838_s27 = scalar_lea.vmem %s2112_s1, %s1395_s24  ;;  %s1840_s28 = sadd.s32 %s1344_s23, %s2129_s22 }
  0x13   : > { %v1572_v0 = vld [vmem:[%s1838_s27] sm:$0xff]   ;;  %v1573_v1 = vld [vmem:[%s1838_s27 + $0x8] sm:$0xff]   ;;  %s1345_s29 = sshll.u32 %s1840_s28, 2  ;;  %v1574_v2 = vld [vmem:[%s1838_s27 + $0x10] sm:$0xff]   ;;  %s1350_s11 = sshll.u32 %s1840_s28, 3 }
  0x14   : > { %1436 = vmatprep.subr.bf16.mxu0 %v1572_v0  ;;  %1516 = vmatprep.subr.bf16.mxu1 %v1572_v0  ;;  %s1849_s6 = scalar_lea.vmem %s2111_s0, %s1345_s29  ;;  %v1575_v3 = vld [vmem:[%s1838_s27 + $0x18] sm:$0xff]   ;;  %v1576_v6 = vld [vmem:[%s1838_s27 + $0x20] sm:$0xff]   ;;  %v1577_v7 = vld [vmem:[%s1838_s27 + $0x28] sm:$0xff]   ;;  %s1928_s14 = scalar_lea.vmem %s2115_s4, %s1350_s11 }
  0x15   : > { %1437 = vmatpush3.bf16.msra.mxu0 %v1572_v0  ;;  %1524 = vmatpush3.bf16.msra.mxu1 %v1572_v0  ;;  %v1580_v4 = vld [vmem:[%s1849_s6] sm:$0xff]   ;;  %v1578_v8 = vld [vmem:[%s1838_s27 + $0x30] sm:$0xff]   ;;  %v1579_v9 = vld [vmem:[%s1838_s27 + $0x38] sm:$0xff]  }
  0x16   : > { %1438 = vmatprep.subr.bf16.mxu0 %v1573_v1  ;;  %1517 = vmatprep.subr.bf16.mxu1 %v1573_v1  ;;  %v1581_v5 = vld [vmem:[%s1849_s6 + $0x80] sm:$0xff]   ;;  %v1582_v10 = vld [vmem:[%s1849_s6 + $0x8] sm:$0xff]   ;;  %v1584_v12 = vld [vmem:[%s1849_s6 + $0x10] sm:$0xff]  }
  0x17   : > { %1452 = vmatprep.mubr.bf16.mxu0 %v1580_v4  ;;  %1484 = vmatprep.mubr.bf16.mxu1 %v1581_v5  ;;  %v1583_v11 = vld [vmem:[%s1849_s6 + $0x88] sm:$0xff]   ;;  %v1585_v13 = vld [vmem:[%s1849_s6 + $0x90] sm:$0xff]   ;;  %v1586_v14 = vld [vmem:[%s1849_s6 + $0x18] sm:$0xff]  }
  0x18   : > { %v1587_v15 = vld [vmem:[%s1849_s6 + $0x98] sm:$0xff]   ;;  %v1588_v16 = vld [vmem:[%s1849_s6 + $0x20] sm:$0xff]   ;;  %v1590_v18 = vld [vmem:[%s1849_s6 + $0x28] sm:$0xff]  }
  0x19   : > { %1439 = vmatpush3.bf16.msra.mxu0 %v1573_v1  ;;  %1525 = vmatpush3.bf16.msra.mxu1 %v1573_v1  ;;  %v1589_v17 = vld [vmem:[%s1849_s6 + $0xa0] sm:$0xff]   ;;  %v1591_v19 = vld [vmem:[%s1849_s6 + $0xa8] sm:$0xff]   ;;  %v1592_v20 = vld [vmem:[%s1849_s6 + $0x30] sm:$0xff]  }
  0x1a   : > { %1440 = vmatprep.subr.bf16.mxu0 %v1574_v2  ;;  %1518 = vmatprep.subr.bf16.mxu1 %v1574_v2  ;;  %v1593_v21 = vld [vmem:[%s1849_s6 + $0xb0] sm:$0xff]   ;;  %v1594_v22 = vld [vmem:[%s1849_s6 + $0x38] sm:$0xff]   ;;  %v1596_v24 = vld [vmem:[%s1849_s6 + $0x40] sm:$0xff]  }
  0x1b   : > { %v1595_v23 = vld [vmem:[%s1849_s6 + $0xb8] sm:$0xff]   ;;  %v1597_v25 = vld [vmem:[%s1849_s6 + $0xc0] sm:$0xff]   ;;  %v1598_v26 = vld [vmem:[%s1849_s6 + $0x48] sm:$0xff]  }
  0x1c   : > { %v1599_v27 = vld [vmem:[%s1849_s6 + $0xc8] sm:$0xff]   ;;  %v1600_v28 = vld [vmem:[%s1849_s6 + $0x50] sm:$0xff]   ;;  %v1602_v30 = vld [vmem:[%s1849_s6 + $0x58] sm:$0xff]  }
  0x1d   : > { %1441 = vmatpush3.bf16.msra.mxu0 %v1574_v2  ;;  %1526 = vmatpush3.bf16.msra.mxu1 %v1574_v2  ;;  %v1601_v29 = vld [vmem:[%s1849_s6 + $0xd0] sm:$0xff]   ;;  %v1603_v31 = vld [vmem:[%s1849_s6 + $0xd8] sm:$0xff]   ;;  %v1604_v32 = vld [vmem:[%s1849_s6 + $0x60] sm:$0xff]  }
  0x1e   : > { %1442 = vmatprep.subr.bf16.mxu0 %v1575_v3  ;;  %1519 = vmatprep.subr.bf16.mxu1 %v1575_v3  ;;  %v1605_v33 = vld [vmem:[%s1849_s6 + $0xe0] sm:$0xff]   ;;  %v1606_v34 = vld [vmem:[%s1849_s6 + $0x68] sm:$0xff]   ;;  %v1608_v36 = vld [vmem:[%s1849_s6 + $0x70] sm:$0xff]  }
  0x1f   : > { %v1607_v35 = vld [vmem:[%s1849_s6 + $0xe8] sm:$0xff]   ;;  %v1609_v37 = vld [vmem:[%s1849_s6 + $0xf0] sm:$0xff]   ;;  %v1610_v38 = vld [vmem:[%s1849_s6 + $0x78] sm:$0xff]  }
  0x20   : > { %v1611_v39 = vld [vmem:[%s1849_s6 + $0xf8] sm:$0xff]  }
  0x21   : > { %1443 = vmatpush3.bf16.msra.mxu0 %v1575_v3  ;;  %1527 = vmatpush3.bf16.msra.mxu1 %v1575_v3 }
  0x22   : > { %1444 = vmatprep.subr.bf16.mxu0 %v1576_v6  ;;  %1520 = vmatprep.subr.bf16.mxu1 %v1576_v6 }
  0x25   : > { %1445 = vmatpush3.bf16.msra.mxu0 %v1576_v6  ;;  %1528 = vmatpush3.bf16.msra.mxu1 %v1576_v6 }
  0x26   : > { %1446 = vmatprep.subr.bf16.mxu0 %v1577_v7  ;;  %1521 = vmatprep.subr.bf16.mxu1 %v1577_v7 }
  0x29   : > { %1447 = vmatpush3.bf16.msra.mxu0 %v1577_v7  ;;  %1529 = vmatpush3.bf16.msra.mxu1 %v1577_v7 }
  0x2a   : > { %1448 = vmatprep.subr.bf16.mxu0 %v1578_v8  ;;  %1522 = vmatprep.subr.bf16.mxu1 %v1578_v8 }
  0x2d   : > { %1449 = vmatpush3.bf16.msra.mxu0 %v1578_v8  ;;  %1530 = vmatpush3.bf16.msra.mxu1 %v1578_v8 }
  0x2e   : > { %1450 = vmatprep.subr.bf16.mxu0 %v1579_v9  ;;  %1523 = vmatprep.subr.bf16.mxu1 %v1579_v9 }
  0x31   : > { %1451 = vmatpush3.bf16.msra.mxu0 %v1579_v9  ;;  %1531 = vmatpush3.bf16.msra.mxu1 %v1579_v9 }
  0x34   : > { %1453 = vmatmul.mubr.bf16.vlgmr.msra.gmra.mrb[0].mxu0 %v1582_v10  ;;  %1485 = vmatmul.mubr.bf16.vlgmr.msra.gmra.mrb[0].mxu1 %v1583_v11 }
  0x35   : > { %1456 = vmatprep.mubr.bf16.mxu0 %v1584_v12  ;;  %1488 = vmatprep.mubr.bf16.mxu1 %v1585_v13 }
  0x3c   : > { %1457 = vmatmul.mubr.bf16.gmra.mrb[4].mxu0 %v1586_v14  ;;  %1489 = vmatmul.mubr.bf16.gmra.mrb[4].mxu1 %v1587_v15 }
  0x3d   : > { %1460 = vmatprep.mubr.bf16.mxu0 %v1588_v16  ;;  %1492 = vmatprep.mubr.bf16.mxu1 %v1589_v17 }
  0x44   : > { %1461 = vmatmul.mubr.bf16.gmra.mrb[8].mxu0 %v1590_v18  ;;  %1493 = vmatmul.mubr.bf16.gmra.mrb[8].mxu1 %v1591_v19 }
  0x45   : > { %1464 = vmatprep.mubr.bf16.mxu0 %v1592_v20  ;;  %1496 = vmatprep.mubr.bf16.mxu1 %v1593_v21 }
  0x4c   : > { %1465 = vmatmul.mubr.bf16.gmra.mrb[12].mxu0 %v1594_v22  ;;  %1497 = vmatmul.mubr.bf16.gmra.mrb[12].mxu1 %v1595_v23 }
  0x4d   : > { %1468 = vmatprep.mubr.bf16.mxu0 %v1596_v24  ;;  %1500 = vmatprep.mubr.bf16.mxu1 %v1597_v25 }
  0x54   : > { %1469 = vmatmul.mubr.bf16.gmra.mrb[16].mxu0 %v1598_v26  ;;  %1501 = vmatmul.mubr.bf16.gmra.mrb[16].mxu1 %v1599_v27 }
  0x55   : > { %1472 = vmatprep.mubr.bf16.mxu0 %v1600_v28  ;;  %1504 = vmatprep.mubr.bf16.mxu1 %v1601_v29 }
  0x5c   : > { %1473 = vmatmul.mubr.bf16.gmra.mrb[20].mxu0 %v1602_v30  ;;  %1505 = vmatmul.mubr.bf16.gmra.mrb[20].mxu1 %v1603_v31 }
  0x5d   : > { %1476 = vmatprep.mubr.bf16.mxu0 %v1604_v32  ;;  %1508 = vmatprep.mubr.bf16.mxu1 %v1605_v33 }
  0x64   : > { %1477 = vmatmul.mubr.bf16.gmra.mrb[24].mxu0 %v1606_v34  ;;  %1509 = vmatmul.mubr.bf16.gmra.mrb[24].mxu1 %v1607_v35 }
  0x65   : > { %1480 = vmatprep.mubr.bf16.mxu0 %v1608_v36  ;;  %1512 = vmatprep.mubr.bf16.mxu1 %v1609_v37 }
  0x6c   : > { %1481 = vmatmul.mubr.bf16.gmra.mrb[28].mxu0 %v1610_v38  ;;  %1513 = vmatmul.mubr.bf16.gmra.mrb[28].mxu1 %v1611_v39 }
 0x107   : > { %v1454_v41 = vpop.f32.mrb[0].mxu0  ;;  %v1486_v43 = vpop.f32.mrb[0].mxu1 }
 0x108   : > { %v930_v44 = vmul.f32 %v1454_v41, %v1891_v40  ;;  %v962_v45 = vmul.f32 %v1486_v43, %v1891_v40  ;;  %v666_v46 = vpop.f32.mrb[1].mxu0  ;;  %v794_v47 = vpop.f32.mrb[1].mxu1 }
 0x109   : > { %v928_v48 = vmul.f32 %v1891_v40, %v666_v46  ;;  %v960_v49 = vmul.f32 %v1891_v40, %v794_v47  ;;  %v1455_v50 = vpop.f32.mrb[2].mxu0  ;;  %v1487_v51 = vpop.f32.mrb[2].mxu1 }
 0x10a   : > { %v1001_v52 = vadd.f32 %v1896_v42, %v930_v44  ;;  %v1033_v53 = vadd.f32 %v1896_v42, %v962_v45  ;;  %v931_v54 = vmul.f32 %v1455_v50, %v1891_v40  ;;  %v963_v55 = vmul.f32 %v1487_v51, %v1891_v40  ;;  %v669_v56 = vpop.f32.mrb[3].mxu0  ;;  %v797_v57 = vpop.f32.mrb[3].mxu1 }
 0x10b   : > { %v999_v58 = vadd.f32 %v1896_v42, %v928_v48  ;;  %v1031_v59 = vadd.f32 %v1896_v42, %v960_v49  ;;  %v929_v60 = vmul.f32 %v1891_v40, %v669_v56  ;;  %v961_v61 = vmul.f32 %v1891_v40, %v797_v57 }
 0x10c   : > { %1612 = vtanh.f32 %v1001_v52  ;;  %v1002_v62 = vadd.f32 %v1896_v42, %v931_v54  ;;  %v1034_v63 = vadd.f32 %v1896_v42, %v963_v55 }
 0x10d   : > { %1614 = vtanh.f32 %v1033_v53  ;;  %v1000_v0 = vadd.f32 %v1896_v42, %v929_v60  ;;  %v1032_v1 = vadd.f32 %v1896_v42, %v961_v61 }
 0x10e   : > { %1616 = vtanh.f32 %v999_v58 }
 0x10f   : > { %1618 = vtanh.f32 %v1031_v59  ;;  %v1458_v2 = vpop.f32.mrb[4].mxu0  ;;  %v1490_v3 = vpop.f32.mrb[4].mxu1 }
 0x110   : > { %1620 = vtanh.f32 %v1002_v62  ;;  %v934_v4 = vmul.f32 %v1458_v2, %v1891_v40  ;;  %v966_v5 = vmul.f32 %v1490_v3, %v1891_v40  ;;  %v682_v6 = vpop.f32.mrb[5].mxu0  ;;  %v810_v7 = vpop.f32.mrb[5].mxu1 }
 0x111   : > { %1622 = vtanh.f32 %v1034_v63  ;;  %v932_v8 = vmul.f32 %v1891_v40, %v682_v6  ;;  %v964_v9 = vmul.f32 %v1891_v40, %v810_v7  ;;  %v1459_v10 = vpop.f32.mrb[6].mxu0  ;;  %v1491_v11 = vpop.f32.mrb[6].mxu1 }
 0x112   : > { %1624 = vtanh.f32 %v1000_v0  ;;  %v1005_v12 = vadd.f32 %v1896_v42, %v934_v4  ;;  %v1037_v13 = vadd.f32 %v1896_v42, %v966_v5  ;;  %v935_v14 = vmul.f32 %v1459_v10, %v1891_v40  ;;  %v685_v15 = vpop.f32.mrb[7].mxu0  ;;  %v813_v16 = vpop.f32.mrb[7].mxu1 }
 0x113   : > { %1626 = vtanh.f32 %v1032_v1  ;;  %v1003_v17 = vadd.f32 %v1896_v42, %v932_v8  ;;  %v1035_v18 = vadd.f32 %v1896_v42, %v964_v9  ;;  %v967_v19 = vmul.f32 %v1491_v11, %v1891_v40 }
 0x114   : > { %1628 = vtanh.f32 %v1005_v12  ;;  %v1006_v20 = vadd.f32 %v1896_v42, %v935_v14  ;;  %v933_v21 = vmul.f32 %v1891_v40, %v685_v15  ;;  %v965_v22 = vmul.f32 %v1891_v40, %v813_v16 }
 0x115   : > { %1630 = vtanh.f32 %v1037_v13  ;;  %v1038_v23 = vadd.f32 %v1896_v42, %v967_v19 }
 0x116   : > { %v1613_v24 = vpop.eup %1612  ;;  %1632 = vtanh.f32 %v1003_v17  ;;  %v1004_v25 = vadd.f32 %v1896_v42, %v933_v21  ;;  %v1036_v27 = vadd.f32 %v1896_v42, %v965_v22 }
 0x117   : > { %v1615_v26 = vpop.eup %1614  ;;  %1129 = vst [vmem:[%s1928_s14 + $0x10] sm:$0xff] %v1613_v24  ;;  %1634 = vtanh.f32 %v1035_v18  ;;  %v1462_v28 = vpop.f32.mrb[8].mxu0 }
 0x118   : > { %v1494_v29 = vpop.f32.mrb[8].mxu1  ;;  %v1617_v30 = vpop.eup %1616  ;;  %1161 = vst [vmem:[%s1928_s14 + $0x110] sm:$0xff] %v1615_v26  ;;  %1636 = vtanh.f32 %v1006_v20  ;;  %v938_v31 = vmul.f32 %v1462_v28, %v1891_v40 }
 0x119   : > { %v970_v32 = vmul.f32 %v1494_v29, %v1891_v40  ;;  %v698_v33 = vpop.f32.mrb[9].mxu0  ;;  %v826_v34 = vpop.f32.mrb[9].mxu1  ;;  %1127 = vst [vmem:[%s1928_s14] sm:$0xff] %v1617_v30  ;;  %1638 = vtanh.f32 %v1038_v23 }
 0x11a   : > { %v1619_v35 = vpop.eup %1618  ;;  %v936_v36 = vmul.f32 %v1891_v40, %v698_v33  ;;  %v968_v37 = vmul.f32 %v1891_v40, %v826_v34  ;;  %v1463_v38 = vpop.f32.mrb[10].mxu0  ;;  %1640 = vtanh.f32 %v1004_v25  ;;  %v1009_v43 = vadd.f32 %v1896_v42, %v938_v31 }
 0x11b   : > { %v1495_v39 = vpop.f32.mrb[10].mxu1  ;;  %v1621_v41 = vpop.eup %1620  ;;  %1159 = vst [vmem:[%s1928_s14 + $0x100] sm:$0xff] %v1619_v35  ;;  %v1041_v44 = vadd.f32 %v1896_v42, %v970_v32  ;;  %v939_v45 = vmul.f32 %v1463_v38, %v1891_v40  ;;  %1642 = vtanh.f32 %v1036_v27 }
 0x11c   : > { %v701_v46 = vpop.f32.mrb[11].mxu0  ;;  %v829_v47 = vpop.f32.mrb[11].mxu1  ;;  %1130 = vst [vmem:[%s1928_s14 + $0x18] sm:$0xff] %v1621_v41  ;;  %v1007_v49 = vadd.f32 %v1896_v42, %v936_v36  ;;  %v1039_v50 = vadd.f32 %v1896_v42, %v968_v37  ;;  %v971_v51 = vmul.f32 %v1495_v39, %v1891_v40  ;;  %1644 = vtanh.f32 %v1009_v43 }
 0x11d   : > { %v1623_v48 = vpop.eup %1622  ;;  %v1010_v53 = vadd.f32 %v1896_v42, %v939_v45  ;;  %v937_v54 = vmul.f32 %v1891_v40, %v701_v46  ;;  %v969_v55 = vmul.f32 %v1891_v40, %v829_v47  ;;  %1646 = vtanh.f32 %v1041_v44 }
 0x11e   : > { %v1625_v52 = vpop.eup %1624  ;;  %1162 = vst [vmem:[%s1928_s14 + $0x118] sm:$0xff] %v1623_v48  ;;  %v1042_v57 = vadd.f32 %v1896_v42, %v971_v51  ;;  %1648 = vtanh.f32 %v1007_v49 }
 0x11f   : > { %v1627_v56 = vpop.eup %1626  ;;  %1128 = vst [vmem:[%s1928_s14 + $0x8] sm:$0xff] %v1625_v52  ;;  %v1008_v59 = vadd.f32 %v1896_v42, %v937_v54  ;;  %1650 = vtanh.f32 %v1039_v50  ;;  %v1040_v61 = vadd.f32 %v1896_v42, %v969_v55  ;;  %v1466_v62 = vpop.f32.mrb[12].mxu0 }
 0x120   : > { %v1629_v58 = vpop.eup %1628  ;;  %1160 = vst [vmem:[%s1928_s14 + $0x108] sm:$0xff] %v1627_v56  ;;  %v1498_v63 = vpop.f32.mrb[12].mxu1  ;;  %1652 = vtanh.f32 %v1010_v53  ;;  %v942_v1 = vmul.f32 %v1466_v62, %v1891_v40 }
 0x121   : > { %v1631_v60 = vpop.eup %1630  ;;  %1133 = vst [vmem:[%s1928_s14 + $0x30] sm:$0xff] %v1629_v58  ;;  %v974_v2 = vmul.f32 %v1498_v63, %v1891_v40  ;;  %v714_v3 = vpop.f32.mrb[13].mxu0  ;;  %1654 = vtanh.f32 %v1042_v57 }
 0x122   : > { %v1633_v0 = vpop.eup %1632  ;;  %1165 = vst [vmem:[%s1928_s14 + $0x130] sm:$0xff] %v1631_v60  ;;  %v842_v4 = vpop.f32.mrb[13].mxu1  ;;  %v940_v6 = vmul.f32 %v1891_v40, %v714_v3  ;;  %1656 = vtanh.f32 %v1008_v59  ;;  %v1013_v11 = vadd.f32 %v1896_v42, %v942_v1 }
 0x123   : > { %v1635_v5 = vpop.eup %1634  ;;  %1131 = vst [vmem:[%s1928_s14 + $0x20] sm:$0xff] %v1633_v0  ;;  %v972_v7 = vmul.f32 %v1891_v40, %v842_v4  ;;  %v1467_v8 = vpop.f32.mrb[14].mxu0  ;;  %v1045_v12 = vadd.f32 %v1896_v42, %v974_v2  ;;  %1658 = vtanh.f32 %v1040_v61 }
 0x124   : > { %v1499_v9 = vpop.f32.mrb[14].mxu1  ;;  %v1637_v10 = vpop.eup %1636  ;;  %1163 = vst [vmem:[%s1928_s14 + $0x120] sm:$0xff] %v1635_v5  ;;  %v943_v13 = vmul.f32 %v1467_v8, %v1891_v40  ;;  %v1011_v17 = vadd.f32 %v1896_v42, %v940_v6  ;;  %1660 = vtanh.f32 %v1013_v11 }
 0x125   : > { %v717_v14 = vpop.f32.mrb[15].mxu0  ;;  %v845_v15 = vpop.f32.mrb[15].mxu1  ;;  %1134 = vst [vmem:[%s1928_s14 + $0x38] sm:$0xff] %v1637_v10  ;;  %v1043_v18 = vadd.f32 %v1896_v42, %v972_v7  ;;  %v975_v19 = vmul.f32 %v1499_v9, %v1891_v40  ;;  %1662 = vtanh.f32 %v1045_v12 }
 0x126   : > { %v1639_v16 = vpop.eup %1638  ;;  %v1014_v21 = vadd.f32 %v1896_v42, %v943_v13  ;;  %v941_v22 = vmul.f32 %v1891_v40, %v717_v14  ;;  %v973_v23 = vmul.f32 %v1891_v40, %v845_v15  ;;  %1664 = vtanh.f32 %v1011_v17 }
 0x127   : > { %v1641_v20 = vpop.eup %1640  ;;  %1166 = vst [vmem:[%s1928_s14 + $0x138] sm:$0xff] %v1639_v16  ;;  %v1046_v25 = vadd.f32 %v1896_v42, %v975_v19  ;;  %1666 = vtanh.f32 %v1043_v18  ;;  %v1470_v30 = vpop.f32.mrb[16].mxu0 }
 0x128   : > { %v1643_v24 = vpop.eup %1642  ;;  %1132 = vst [vmem:[%s1928_s14 + $0x28] sm:$0xff] %v1641_v20  ;;  %v1012_v27 = vadd.f32 %v1896_v42, %v941_v22  ;;  %v1044_v29 = vadd.f32 %v1896_v42, %v973_v23  ;;  %v1502_v31 = vpop.f32.mrb[16].mxu1  ;;  %1668 = vtanh.f32 %v1014_v21  ;;  %v946_v33 = vmul.f32 %v1470_v30, %v1891_v40 }
 0x129   : > { %v1645_v26 = vpop.eup %1644  ;;  %1164 = vst [vmem:[%s1928_s14 + $0x128] sm:$0xff] %v1643_v24  ;;  %v978_v34 = vmul.f32 %v1502_v31, %v1891_v40  ;;  %v730_v35 = vpop.f32.mrb[17].mxu0  ;;  %1670 = vtanh.f32 %v1046_v25 }
 0x12a   : > { %v1647_v28 = vpop.eup %1646  ;;  %1137 = vst [vmem:[%s1928_s14 + $0x50] sm:$0xff] %v1645_v26  ;;  %v858_v36 = vpop.f32.mrb[17].mxu1  ;;  %v944_v38 = vmul.f32 %v1891_v40, %v730_v35  ;;  %1672 = vtanh.f32 %v1012_v27  ;;  %v1017_v45 = vadd.f32 %v1896_v42, %v946_v33 }
 0x12b   : > { %v1649_v32 = vpop.eup %1648  ;;  %1169 = vst [vmem:[%s1928_s14 + $0x150] sm:$0xff] %v1647_v28  ;;  %v976_v39 = vmul.f32 %v1891_v40, %v858_v36  ;;  %v1471_v41 = vpop.f32.mrb[18].mxu0  ;;  %v1049_v46 = vadd.f32 %v1896_v42, %v978_v34  ;;  %1674 = vtanh.f32 %v1044_v29 }
 0x12c   : > { %v1651_v37 = vpop.eup %1650  ;;  %1135 = vst [vmem:[%s1928_s14 + $0x40] sm:$0xff] %v1649_v32  ;;  %v1503_v43 = vpop.f32.mrb[18].mxu1  ;;  %v947_v47 = vmul.f32 %v1471_v41, %v1891_v40  ;;  %v1015_v51 = vadd.f32 %v1896_v42, %v944_v38  ;;  %1676 = vtanh.f32 %v1017_v45 }
 0x12d   : > { %v1653_v44 = vpop.eup %1652  ;;  %1167 = vst [vmem:[%s1928_s14 + $0x140] sm:$0xff] %v1651_v37  ;;  %v733_v48 = vpop.f32.mrb[19].mxu0  ;;  %v1047_v52 = vadd.f32 %v1896_v42, %v976_v39  ;;  %v979_v53 = vmul.f32 %v1503_v43, %v1891_v40  ;;  %1678 = vtanh.f32 %v1049_v46 }
 0x12e   : > { %v861_v49 = vpop.f32.mrb[19].mxu1  ;;  %v1655_v50 = vpop.eup %1654  ;;  %1138 = vst [vmem:[%s1928_s14 + $0x58] sm:$0xff] %v1653_v44  ;;  %v1018_v55 = vadd.f32 %v1896_v42, %v947_v47  ;;  %v945_v56 = vmul.f32 %v1891_v40, %v733_v48  ;;  %1680 = vtanh.f32 %v1015_v51 }
 0x12f   : > { %v1657_v54 = vpop.eup %1656  ;;  %1170 = vst [vmem:[%s1928_s14 + $0x158] sm:$0xff] %v1655_v50  ;;  %v977_v57 = vmul.f32 %v1891_v40, %v861_v49  ;;  %v1050_v59 = vadd.f32 %v1896_v42, %v979_v53  ;;  %1682 = vtanh.f32 %v1047_v52  ;;  %v1474_v0 = vpop.f32.mrb[20].mxu0 }
 0x130   : > { %v1659_v58 = vpop.eup %1658  ;;  %1136 = vst [vmem:[%s1928_s14 + $0x48] sm:$0xff] %v1657_v54  ;;  %v1016_v61 = vadd.f32 %v1896_v42, %v945_v56  ;;  %v1506_v1 = vpop.f32.mrb[20].mxu1  ;;  %1684 = vtanh.f32 %v1018_v55  ;;  %v950_v3 = vmul.f32 %v1474_v0, %v1891_v40 }
 0x131   : > { %v1661_v60 = vpop.eup %1660  ;;  %1168 = vst [vmem:[%s1928_s14 + $0x148] sm:$0xff] %v1659_v58  ;;  %v1048_v63 = vadd.f32 %v1896_v42, %v977_v57  ;;  %v982_v4 = vmul.f32 %v1506_v1, %v1891_v40  ;;  %v746_v5 = vpop.f32.mrb[21].mxu0  ;;  %1686 = vtanh.f32 %v1050_v59 }
 0x132   : > { %v1663_v62 = vpop.eup %1662  ;;  %1141 = vst [vmem:[%s1928_s14 + $0x70] sm:$0xff] %v1661_v60  ;;  %v874_v6 = vpop.f32.mrb[21].mxu1  ;;  %v948_v8 = vmul.f32 %v1891_v40, %v746_v5  ;;  %1688 = vtanh.f32 %v1016_v61  ;;  %v1021_v13 = vadd.f32 %v1896_v42, %v950_v3 }
 0x133   : > { %v1665_v2 = vpop.eup %1664  ;;  %1173 = vst [vmem:[%s1928_s14 + $0x170] sm:$0xff] %v1663_v62  ;;  %v980_v9 = vmul.f32 %v1891_v40, %v874_v6  ;;  %v1475_v10 = vpop.f32.mrb[22].mxu0  ;;  %v1053_v14 = vadd.f32 %v1896_v42, %v982_v4  ;;  %1690 = vtanh.f32 %v1048_v63 }
 0x134   : > { %v1667_v7 = vpop.eup %1666  ;;  %1139 = vst [vmem:[%s1928_s14 + $0x60] sm:$0xff] %v1665_v2  ;;  %v1507_v11 = vpop.f32.mrb[22].mxu1  ;;  %v951_v15 = vmul.f32 %v1475_v10, %v1891_v40  ;;  %v1019_v19 = vadd.f32 %v1896_v42, %v948_v8  ;;  %1692 = vtanh.f32 %v1021_v13 }
 0x135   : > { %v1669_v12 = vpop.eup %1668  ;;  %1171 = vst [vmem:[%s1928_s14 + $0x160] sm:$0xff] %v1667_v7  ;;  %v749_v16 = vpop.f32.mrb[23].mxu0  ;;  %v1051_v20 = vadd.f32 %v1896_v42, %v980_v9  ;;  %v983_v21 = vmul.f32 %v1507_v11, %v1891_v40  ;;  %1694 = vtanh.f32 %v1053_v14 }
 0x136   : > { %v877_v17 = vpop.f32.mrb[23].mxu1  ;;  %v1671_v18 = vpop.eup %1670  ;;  %1142 = vst [vmem:[%s1928_s14 + $0x78] sm:$0xff] %v1669_v12  ;;  %v1022_v23 = vadd.f32 %v1896_v42, %v951_v15  ;;  %v949_v24 = vmul.f32 %v1891_v40, %v749_v16  ;;  %1696 = vtanh.f32 %v1019_v19 }
 0x137   : > { %v1673_v22 = vpop.eup %1672  ;;  %1174 = vst [vmem:[%s1928_s14 + $0x178] sm:$0xff] %v1671_v18  ;;  %v981_v25 = vmul.f32 %v1891_v40, %v877_v17  ;;  %v1054_v27 = vadd.f32 %v1896_v42, %v983_v21  ;;  %1698 = vtanh.f32 %v1051_v20  ;;  %v1478_v32 = vpop.f32.mrb[24].mxu0 }
 0x138   : > { %v1675_v26 = vpop.eup %1674  ;;  %1140 = vst [vmem:[%s1928_s14 + $0x68] sm:$0xff] %v1673_v22  ;;  %v1020_v29 = vadd.f32 %v1896_v42, %v949_v24  ;;  %v1510_v33 = vpop.f32.mrb[24].mxu1  ;;  %1700 = vtanh.f32 %v1022_v23  ;;  %v954_v35 = vmul.f32 %v1478_v32, %v1891_v40 }
 0x139   : > { %v1677_v28 = vpop.eup %1676  ;;  %1172 = vst [vmem:[%s1928_s14 + $0x168] sm:$0xff] %v1675_v26  ;;  %v1052_v31 = vadd.f32 %v1896_v42, %v981_v25  ;;  %v986_v36 = vmul.f32 %v1510_v33, %v1891_v40  ;;  %v762_v37 = vpop.f32.mrb[25].mxu0  ;;  %1702 = vtanh.f32 %v1054_v27 }
 0x13a   : > { %v1679_v30 = vpop.eup %1678  ;;  %1145 = vst [vmem:[%s1928_s14 + $0x90] sm:$0xff] %v1677_v28  ;;  %v890_v38 = vpop.f32.mrb[25].mxu1  ;;  %v952_v41 = vmul.f32 %v1891_v40, %v762_v37  ;;  %1704 = vtanh.f32 %v1020_v29  ;;  %v1025_v47 = vadd.f32 %v1896_v42, %v954_v35 }
 0x13b   : > { %v1681_v34 = vpop.eup %1680  ;;  %1177 = vst [vmem:[%s1928_s14 + $0x190] sm:$0xff] %v1679_v30  ;;  %v984_v43 = vmul.f32 %v1891_v40, %v890_v38  ;;  %v1479_v44 = vpop.f32.mrb[26].mxu0  ;;  %v1057_v48 = vadd.f32 %v1896_v42, %v986_v36  ;;  %1706 = vtanh.f32 %v1052_v31 }
 0x13c   : > { %v1683_v39 = vpop.eup %1682  ;;  %1143 = vst [vmem:[%s1928_s14 + $0x80] sm:$0xff] %v1681_v34  ;;  %v1511_v45 = vpop.f32.mrb[26].mxu1  ;;  %v955_v49 = vmul.f32 %v1479_v44, %v1891_v40  ;;  %v1023_v53 = vadd.f32 %v1896_v42, %v952_v41  ;;  %1708 = vtanh.f32 %v1025_v47 }
 0x13d   : > { %v1685_v46 = vpop.eup %1684  ;;  %1175 = vst [vmem:[%s1928_s14 + $0x180] sm:$0xff] %v1683_v39  ;;  %v765_v50 = vpop.f32.mrb[27].mxu0  ;;  %v1055_v54 = vadd.f32 %v1896_v42, %v984_v43  ;;  %v987_v55 = vmul.f32 %v1511_v45, %v1891_v40  ;;  %1710 = vtanh.f32 %v1057_v48 }
 0x13e   : > { %v893_v51 = vpop.f32.mrb[27].mxu1  ;;  %v1687_v52 = vpop.eup %1686  ;;  %1146 = vst [vmem:[%s1928_s14 + $0x98] sm:$0xff] %v1685_v46  ;;  %v1026_v57 = vadd.f32 %v1896_v42, %v955_v49  ;;  %v953_v58 = vmul.f32 %v1891_v40, %v765_v50  ;;  %1712 = vtanh.f32 %v1023_v53 }
 0x13f   : > { %v1689_v56 = vpop.eup %1688  ;;  %1178 = vst [vmem:[%s1928_s14 + $0x198] sm:$0xff] %v1687_v52  ;;  %v985_v59 = vmul.f32 %v1891_v40, %v893_v51  ;;  %v1058_v61 = vadd.f32 %v1896_v42, %v987_v55  ;;  %1714 = vtanh.f32 %v1055_v54  ;;  %v1482_v2 = vpop.f32.mrb[28].mxu0 }
 0x140   : > { %v1691_v60 = vpop.eup %1690  ;;  %1144 = vst [vmem:[%s1928_s14 + $0x88] sm:$0xff] %v1689_v56  ;;  %v1024_v63 = vadd.f32 %v1896_v42, %v953_v58  ;;  %v1514_v3 = vpop.f32.mrb[28].mxu1  ;;  %1716 = vtanh.f32 %v1026_v57  ;;  %v958_v5 = vmul.f32 %v1482_v2, %v1891_v40 }
 0x141   : > { %v1693_v62 = vpop.eup %1692  ;;  %1176 = vst [vmem:[%s1928_s14 + $0x188] sm:$0xff] %v1691_v60  ;;  %v1056_v1 = vadd.f32 %v1896_v42, %v985_v59  ;;  %v990_v6 = vmul.f32 %v1514_v3, %v1891_v40  ;;  %v778_v7 = vpop.f32.mrb[29].mxu0  ;;  %1718 = vtanh.f32 %v1058_v61 }
 0x142   : > { %v1695_v0 = vpop.eup %1694  ;;  %1149 = vst [vmem:[%s1928_s14 + $0xb0] sm:$0xff] %v1693_v62  ;;  %v906_v8 = vpop.f32.mrb[29].mxu1  ;;  %v956_v10 = vmul.f32 %v1891_v40, %v778_v7  ;;  %1720 = vtanh.f32 %v1024_v63  ;;  %v1029_v15 = vadd.f32 %v1896_v42, %v958_v5 }
 0x143   : > { %v1697_v4 = vpop.eup %1696  ;;  %1181 = vst [vmem:[%s1928_s14 + $0x1b0] sm:$0xff] %v1695_v0  ;;  %v988_v11 = vmul.f32 %v1891_v40, %v906_v8  ;;  %v1483_v12 = vpop.f32.mrb[30].mxu0  ;;  %v1061_v16 = vadd.f32 %v1896_v42, %v990_v6  ;;  %1722 = vtanh.f32 %v1056_v1 }
 0x144   : > { %v1699_v9 = vpop.eup %1698  ;;  %1147 = vst [vmem:[%s1928_s14 + $0xa0] sm:$0xff] %v1697_v4  ;;  %v1515_v13 = vpop.f32.mrb[30].mxu1  ;;  %v959_v17 = vmul.f32 %v1483_v12, %v1891_v40  ;;  %v1027_v21 = vadd.f32 %v1896_v42, %v956_v10  ;;  %1724 = vtanh.f32 %v1029_v15 }
 0x145   : > { %v1701_v14 = vpop.eup %1700  ;;  %1179 = vst [vmem:[%s1928_s14 + $0x1a0] sm:$0xff] %v1699_v9  ;;  %v781_v18 = vpop.f32.mrb[31].mxu0  ;;  %v1059_v22 = vadd.f32 %v1896_v42, %v988_v11  ;;  %v991_v23 = vmul.f32 %v1515_v13, %v1891_v40  ;;  %1726 = vtanh.f32 %v1061_v16 }
 0x146   : > { %v909_v19 = vpop.f32.mrb[31].mxu1  ;;  %v1703_v20 = vpop.eup %1702  ;;  %1150 = vst [vmem:[%s1928_s14 + $0xb8] sm:$0xff] %v1701_v14  ;;  %v1030_v25 = vadd.f32 %v1896_v42, %v959_v17  ;;  %v957_v26 = vmul.f32 %v1891_v40, %v781_v18  ;;  %1728 = vtanh.f32 %v1027_v21 }
 0x147   : > { %v1705_v24 = vpop.eup %1704  ;;  %1182 = vst [vmem:[%s1928_s14 + $0x1b8] sm:$0xff] %v1703_v20  ;;  %v989_v27 = vmul.f32 %v1891_v40, %v909_v19  ;;  %v1062_v29 = vadd.f32 %v1896_v42, %v991_v23  ;;  %1730 = vtanh.f32 %v1059_v22 }
 0x148   : > { %v1707_v28 = vpop.eup %1706  ;;  %1148 = vst [vmem:[%s1928_s14 + $0xa8] sm:$0xff] %v1705_v24  ;;  %v1028_v31 = vadd.f32 %v1896_v42, %v957_v26  ;;  %1732 = vtanh.f32 %v1030_v25 }
 0x149   : > { %v1709_v30 = vpop.eup %1708  ;;  %1180 = vst [vmem:[%s1928_s14 + $0x1a8] sm:$0xff] %v1707_v28  ;;  %v1060_v33 = vadd.f32 %v1896_v42, %v989_v27  ;;  %1734 = vtanh.f32 %v1062_v29 }
 0x14a   : > { %v1711_v32 = vpop.eup %1710  ;;  %1153 = vst [vmem:[%s1928_s14 + $0xd0] sm:$0xff] %v1709_v30  ;;  %1736 = vtanh.f32 %v1028_v31 }
 0x14b   : > { %v1713_v40 = vpop.eup %1712  ;;  %1185 = vst [vmem:[%s1928_s14 + $0x1d0] sm:$0xff] %v1711_v32  ;;  %1738 = vtanh.f32 %v1060_v33 }
 0x14c   : > { %v1715_v34 = vpop.eup %1714  ;;  %1151 = vst [vmem:[%s1928_s14 + $0xc0] sm:$0xff] %v1713_v40 }
 0x14d   : > { %v1717_v35 = vpop.eup %1716  ;;  %1183 = vst [vmem:[%s1928_s14 + $0x1c0] sm:$0xff] %v1715_v34 }
 0x14e   : > { %v1719_v36 = vpop.eup %1718  ;;  %1154 = vst [vmem:[%s1928_s14 + $0xd8] sm:$0xff] %v1717_v35 }
 0x14f   : > { %v1721_v42 = vpop.eup %1720  ;;  %1186 = vst [vmem:[%s1928_s14 + $0x1d8] sm:$0xff] %v1719_v36 }
 0x150   : > { %v1723_v37 = vpop.eup %1722  ;;  %1152 = vst [vmem:[%s1928_s14 + $0xc8] sm:$0xff] %v1721_v42 }
 0x151   : > { %v1725_v38 = vpop.eup %1724  ;;  %1184 = vst [vmem:[%s1928_s14 + $0x1c8] sm:$0xff] %v1723_v37 }
 0x152   : > { %v1727_v39 = vpop.eup %1726  ;;  %1157 = vst [vmem:[%s1928_s14 + $0xf0] sm:$0xff] %v1725_v38 }
 0x153   : > { %v1729_v41 = vpop.eup %1728  ;;  %1189 = vst [vmem:[%s1928_s14 + $0x1f0] sm:$0xff] %v1727_v39 }
 0x154   : > { %v1731_v43 = vpop.eup %1730  ;;  %1155 = vst [vmem:[%s1928_s14 + $0xe0] sm:$0xff] %v1729_v41 }
 0x155   : > { %v1733_v44 = vpop.eup %1732  ;;  %1187 = vst [vmem:[%s1928_s14 + $0x1e0] sm:$0xff] %v1731_v43 }
 0x156   : > { %v1735_v45 = vpop.eup %1734  ;;  %1158 = vst [vmem:[%s1928_s14 + $0xf8] sm:$0xff] %v1733_v44 }
 0x157   : > { %v1737_v46 = vpop.eup %1736  ;;  %1190 = vst [vmem:[%s1928_s14 + $0x1f8] sm:$0xff] %v1735_v45 }
 0x158   : > { %v1739_v47 = vpop.eup %1738  ;;  %1156 = vst [vmem:[%s1928_s14 + $0xe8] sm:$0xff] %v1737_v46 }
 0x159   : > { %1188 = vst [vmem:[%s1928_s14 + $0x1e8] sm:$0xff] %v1739_v47 }
 0x15a PF: > { %s14_s19 = sadd.s32 1, %s1778_s19   ;;  %s2116_s15 = smov %s1770_s17 }
 0x15b   : > { %p11_p7 = scmp.ge.s32.totalorder %s14_s19, 18   ;;  %s2117_s16 = smov %s1774_s18 }
 0x15c   : > { %s2118_s17 = smov %s2121_s20  ;;  %s2119_s18 = smov %s2125_s21 }
 0x15d   :  { %13 = sbr.rel (!%p11_p7) target bundleno = 3 (0x3), region = 75 }

</bundles_post_ra>
